<compile_context>
chip_gen: v6e
topology: v6e:2x2x1
jax: 0.10.0
libtpu: 0.0.40
codegen_flags: <defaults>
</compile_context>

<pallas_src>
import functools

import numpy as np
import jax
import jax.numpy as jnp
from jax import lax
from jax.experimental import pallas as pl
from jax.experimental.pallas import tpu as pltpu


# --------------------- flux: 0.05 * f_real(u), Horner form -------------------
# 0.05 flux scale folded into the numerator coefficients at trace time.
_A0 = 0.05 * 0.5864813977648344
_A1 = 0.05 * -1.1652052887708202
_A2 = 0.05 * 0.4012576646892352
_A3 = 0.05 * 3.3237370892124386e-05
_B0 = -0.6698385882971303
_B1 = 1.3475365242369104
_B2 = -2.0829050389978403
_B3 = -0.00017249228191796602


def _flux(u):
    num = ((_A3 * u + _A2) * u + _A1) * u + _A0
    den = ((_B3 * u + _B2) * u + _B1) * u + _B0
    return num / den          # exact divide (approx reciprocal compounds error)


# ------------------------------ Pallas kernel --------------------------------
def _chunk_kernel(init_ref, traj_ref, u_scratch, *, lam, M, N, t_chunk):
    """One grid step advances t_chunk time steps; traj_ref block is (t_chunk,B,N)."""
    i = pl.program_id(0)

    # Boundary masks hoisted out of the inner time loop (JAX does not CSE
    # broadcast_in_dim; inside the loop these would re-materialize every step).
    col = lax.broadcasted_iota(jnp.int32, u_scratch.shape, dimension=1)
    mask0 = col == 0
    maskN = col == N - 1

    def step(u):
        f = _flux(u)
        mu = M * u
        # f_half[:, j] = 0.5*(f_j + f_{j+1}) - 0.5*M*(u_{j+1} - u_j)
        #             = 0.5*((f_j + M*u_j) + (f_{j+1} - M*u_{j+1}))
        f_half = 0.5 * ((f + mu) + pltpu.roll(f - mu, N - 1, axis=1))
        # f_half[:, j-1] is just a lane rotation of f_half[:, j].
        # coefficient a() == 1.0 everywhere in the reference module.
        u_int = u - lam * (f_half - pltpu.roll(f_half, 1, axis=1))
        # Circular-wrap garbage only lands in columns 0 and N-1, which are
        # overwritten by the boundary conditions u[:,0]=u[:,1], u[:,N-1]=u[:,N-2].
        u_new = jnp.where(
            mask0, pltpu.roll(u_int, N - 1, axis=1),
            jnp.where(maskN, pltpu.roll(u_int, 1, axis=1), u_int))
        return u_new

    def body(t, u):
        u_new = step(u)
        traj_ref[t] = u_new
        return u_new

    @pl.when(i == 0)
    def _():
        u0 = init_ref[...]
        traj_ref[0] = u0                      # trajectories[0] = init
        u_scratch[...] = lax.fori_loop(1, t_chunk, body, u0, unroll=True)

    @pl.when(i > 0)
    def _():
        u_scratch[...] = lax.fori_loop(0, t_chunk, body, u_scratch[...],
                                       unroll=True)


def variant_coe_linear1d_predict(init, stepnum, *, dt, dx, M, t_chunk=8):
    """init: (batch, N) float32 -> trajectories (stepnum, batch, N) float32."""
    init = init.astype(jnp.float32)
    B, N = init.shape
    t_chunk = max(1, min(int(t_chunk), int(stepnum)))
    n_chunks = pl.cdiv(int(stepnum), t_chunk)
    padded_steps = n_chunks * t_chunk

    kernel = functools.partial(
        _chunk_kernel, lam=float(dt) / float(dx), M=float(M), N=N,
        t_chunk=t_chunk)

    traj = pl.pallas_call(
        kernel,
        out_shape=jax.ShapeDtypeStruct((padded_steps, B, N), jnp.float32),
        grid_spec=pltpu.PrefetchScalarGridSpec(
            num_scalar_prefetch=0,
            grid=(n_chunks,),
            in_specs=[pl.BlockSpec((B, N), lambda i: (0, 0))],
            out_specs=pl.BlockSpec((t_chunk, B, N), lambda i: (i, 0, 0)),
            scratch_shapes=[pltpu.VMEM((B, N), jnp.float32)],
        ),
        # Time axis is inherently sequential. (A 'parallel' batch-tile axis
        # would only help on v7x's 2 TCs once B grows beyond a few rows.)
        compiler_params=pltpu.CompilerParams(
            dimension_semantics=("arbitrary",)),
    )(init)
    return traj[:stepnum] if padded_steps != stepnum else traj


# --------------------------- pure-numpy reference ----------------------------
def _f_real_np(u):
    molecular = (-1.1652052887708202 * u
                 + 0.5864813977648344
                 + 0.4012576646892352 * u * u
                 + 3.3237370892124386e-05 * u * u * u)
    denominator = (-2.0829050389978403 * u * u
                   + 1.3475365242369104 * u
                   - 0.6698385882971303
                   - 0.00017249228191796602 * u * u * u)
    return molecular / denominator


def _reference(init, stepnum, dt, dx, M):
    u = np.asarray(init, dtype=np.float32)
    B, N = u.shape
    traj = np.zeros((stepnum, B, N), dtype=np.float32)
    traj[0] = u
    for i in range(1, stepnum):
        f = np.float32(0.05) * np.asarray(_f_real_np(u), dtype=np.float32)
        f_half = (0.5 * (f[:, :-1] + f[:, 1:])
                  - 0.5 * M * (u[:, 1:] - u[:, :-1]))
        u_new = np.empty_like(u)
        u_new[:, 1:N - 1] = (u[:, 1:N - 1]
                             - (dt / dx) * (f_half[:, 1:] - f_half[:, :-1]))
        u_new[:, 0] = u_new[:, 1]
        u_new[:, N - 1] = u_new[:, N - 2]
        u = u_new
        traj[i] = u
    return traj


# ---------------------------------- main -------------------------------------
if __name__ == "__main__":
    batch_size = 2
    N = 128          # 1-D spatial grid points (lane axis)
    stepnum = 64     # trajectory length (8 grid iterations of 8 fused steps)
    dt = 0.004
    dx = 0.1
    M = 0.5          # Lax-Friedrichs viscosity constant (self.M buffer)

    key = jax.random.PRNGKey(0)
    # u in [0, 1]; the rational flux's denominator has no real roots there.
    init = jax.random.uniform(key, (batch_size, N), dtype=jnp.float32)

    traj = variant_coe_linear1d_predict(init, stepnum, dt=dt, dx=dx, M=M,
                                        t_chunk=8)
    traj = jax.block_until_ready(traj)

    ref = _reference(np.asarray(init), stepnum, dt, dx, M)
    np.testing.assert_allclose(np.asarray(traj), ref, rtol=1e-4, atol=1e-4)

    print("KERNEL_OK")
</pallas_src>

<mosaic_0001>
module attributes {stable_mosaic.version = 11 : i64} {
  func.func @_chunk_kernel(%arg0: i32, %arg1: memref<2x128xf32, #tpu.memory_space<vmem>>, %arg2: memref<8x2x128xf32, #tpu.memory_space<vmem>>, %arg3: memref<2x128xf32, #tpu.memory_space<vmem>>) attributes {dimension_semantics = [#tpu.dimension_semantics<arbitrary>], iteration_bounds = array<i64: 8>, scalar_prefetch = 0 : i64, scratch_operands = 1 : i64, tpu.core_type = #tpu.core_type<tc>, window_params = [{pipeline_mode = #tpu.pipeline_mode<synchronous>, transform_indices = @transform_0, window_bounds = array<i64: 2, 128>}, {transform_indices = @transform_1, window_bounds = array<i64: 8, 2, 128>}]} {
    %0 = tpu.iota {dimensions = array<i32: 1>} : vector<2x128xi32>
    %c0_i32 = arith.constant 0 : i32
    %1 = vector.broadcast %c0_i32 : i32 to vector<2x128xi32>
    %2 = arith.cmpi eq, %0, %1 : vector<2x128xi32>
    %c127_i32 = arith.constant 127 : i32
    %3 = vector.broadcast %c127_i32 : i32 to vector<2x128xi32>
    %4 = arith.cmpi eq, %0, %3 : vector<2x128xi32>
    %c0_i32_0 = arith.constant 0 : i32
    %5 = arith.cmpi eq, %arg0, %c0_i32_0 : i32
    %6 = arith.extui %5 : i1 to i32
    %c0_i32_1 = arith.constant 0 : i32
    %7 = arith.cmpi ne, %6, %c0_i32_1 : i32
    scf.if %7 {
      %c0 = arith.constant 0 : index
      %c0_4 = arith.constant 0 : index
      %11 = vector.load %arg1[%c0, %c0_4] : memref<2x128xf32, #tpu.memory_space<vmem>>, vector<2x128xf32>
      %c0_5 = arith.constant 0 : index
      %c0_6 = arith.constant 0 : index
      %c0_7 = arith.constant 0 : index
      %12 = vector.load %arg2[%c0_5, %c0_6, %c0_7] : memref<8x2x128xf32, #tpu.memory_space<vmem>>, vector<1x2x128xf32>
      %13 = vector.shape_cast %12 : vector<1x2x128xf32> to vector<2x128xf32>
      %14 = vector.shape_cast %11 : vector<2x128xf32> to vector<1x2x128xf32>
      tpu.vector_store %arg2[%c0_5, %c0_6, %c0_7], %14 {strides = array<i32>} : memref<8x2x128xf32, #tpu.memory_space<vmem>>, vector<1x2x128xf32>,
      %c1_i32 = arith.constant 1 : i32
      %cst = arith.constant 1.66186851E-6 : f32
      %15 = vector.broadcast %cst : f32 to vector<2x128xf32>
      %16 = arith.mulf %15, %11 : vector<2x128xf32>
      %cst_8 = arith.constant 0.0200628825 : f32
      %17 = vector.broadcast %cst_8 : f32 to vector<2x128xf32>
      %18 = arith.addf %16, %17 : vector<2x128xf32>
      %19 = arith.mulf %18, %11 : vector<2x128xf32>
      %cst_9 = arith.constant -0.0582602657 : f32
      %20 = vector.broadcast %cst_9 : f32 to vector<2x128xf32>
      %21 = arith.addf %19, %20 : vector<2x128xf32>
      %22 = arith.mulf %21, %11 : vector<2x128xf32>
      %cst_10 = arith.constant 0.0293240696 : f32
      %23 = vector.broadcast %cst_10 : f32 to vector<2x128xf32>
      %24 = arith.addf %22, %23 : vector<2x128xf32>
      %cst_11 = arith.constant -1.72492277E-4 : f32
      %25 = vector.broadcast %cst_11 : f32 to vector<2x128xf32>
      %26 = arith.mulf %25, %11 : vector<2x128xf32>
      %cst_12 = arith.constant -2.08290505 : f32
      %27 = vector.broadcast %cst_12 : f32 to vector<2x128xf32>
      %28 = arith.addf %26, %27 : vector<2x128xf32>
      %29 = arith.mulf %28, %11 : vector<2x128xf32>
      %cst_13 = arith.constant 1.34753656 : f32
      %30 = vector.broadcast %cst_13 : f32 to vector<2x128xf32>
      %31 = arith.addf %29, %30 : vector<2x128xf32>
      %32 = arith.mulf %31, %11 : vector<2x128xf32>
      %cst_14 = arith.constant -0.669838607 : f32
      %33 = vector.broadcast %cst_14 : f32 to vector<2x128xf32>
      %34 = arith.addf %32, %33 : vector<2x128xf32>
      %35 = arith.divf %24, %34 : vector<2x128xf32>
      %cst_15 = arith.constant 5.000000e-01 : f32
      %36 = vector.broadcast %cst_15 : f32 to vector<2x128xf32>
      %37 = arith.mulf %36, %11 : vector<2x128xf32>
      %38 = arith.addf %35, %37 : vector<2x128xf32>
      %39 = arith.subf %35, %37 : vector<2x128xf32>
      %c127_i32_16 = arith.constant 127 : i32
      %40 = tpu.dynamic_rotate %39 by %c127_i32_16 dim 1 : vector<2x128xf32>, i32 -> vector<2x128xf32>
      %41 = arith.addf %38, %40 : vector<2x128xf32>
      %cst_17 = arith.constant 5.000000e-01 : f32
      %42 = vector.broadcast %cst_17 : f32 to vector<2x128xf32>
      %43 = arith.mulf %42, %41 : vector<2x128xf32>
      %c1_i32_18 = arith.constant 1 : i32
      %44 = tpu.dynamic_rotate %43 by %c1_i32_18 dim 1 : vector<2x128xf32>, i32 -> vector<2x128xf32>
      %45 = arith.subf %43, %44 : vector<2x128xf32>
      %cst_19 = arith.constant 4.000000e-02 : f32
      %46 = vector.broadcast %cst_19 : f32 to vector<2x128xf32>
      %47 = arith.mulf %46, %45 : vector<2x128xf32>
      %48 = arith.subf %11, %47 : vector<2x128xf32>
      %c127_i32_20 = arith.constant 127 : i32
      %49 = tpu.dynamic_rotate %48 by %c127_i32_20 dim 1 : vector<2x128xf32>, i32 -> vector<2x128xf32>
      %c1_i32_21 = arith.constant 1 : i32
      %50 = tpu.dynamic_rotate %48 by %c1_i32_21 dim 1 : vector<2x128xf32>, i32 -> vector<2x128xf32>
      %51 = arith.select %4, %50, %48 : vector<2x128xi1>, vector<2x128xf32>
      %52 = arith.select %2, %49, %51 : vector<2x128xi1>, vector<2x128xf32>
      %53 = arith.index_cast %c1_i32 : i32 to index
      %c0_22 = arith.constant 0 : index
      %c0_23 = arith.constant 0 : index
      %54 = vector.load %arg2[%53, %c0_22, %c0_23] : memref<8x2x128xf32, #tpu.memory_space<vmem>>, vector<1x2x128xf32>
      %55 = vector.shape_cast %54 : vector<1x2x128xf32> to vector<2x128xf32>
      %56 = vector.shape_cast %52 : vector<2x128xf32> to vector<1x2x128xf32>
      tpu.vector_store %arg2[%53, %c0_22, %c0_23], %56 {strides = array<i32>} : memref<8x2x128xf32, #tpu.memory_space<vmem>>, vector<1x2x128xf32>,
      %c2_i32 = arith.constant 2 : i32
      %cst_24 = arith.constant 1.66186851E-6 : f32
      %57 = vector.broadcast %cst_24 : f32 to vector<2x128xf32>
      %58 = arith.mulf %57, %52 : vector<2x128xf32>
      %cst_25 = arith.constant 0.0200628825 : f32
      %59 = vector.broadcast %cst_25 : f32 to vector<2x128xf32>
      %60 = arith.addf %58, %59 : vector<2x128xf32>
      %61 = arith.mulf %60, %52 : vector<2x128xf32>
      %cst_26 = arith.constant -0.0582602657 : f32
      %62 = vector.broadcast %cst_26 : f32 to vector<2x128xf32>
      %63 = arith.addf %61, %62 : vector<2x128xf32>
      %64 = arith.mulf %63, %52 : vector<2x128xf32>
      %cst_27 = arith.constant 0.0293240696 : f32
      %65 = vector.broadcast %cst_27 : f32 to vector<2x128xf32>
      %66 = arith.addf %64, %65 : vector<2x128xf32>
      %cst_28 = arith.constant -1.72492277E-4 : f32
      %67 = vector.broadcast %cst_28 : f32 to vector<2x128xf32>
      %68 = arith.mulf %67, %52 : vector<2x128xf32>
      %cst_29 = arith.constant -2.08290505 : f32
      %69 = vector.broadcast %cst_29 : f32 to vector<2x128xf32>
      %70 = arith.addf %68, %69 : vector<2x128xf32>
      %71 = arith.mulf %70, %52 : vector<2x128xf32>
      %cst_30 = arith.constant 1.34753656 : f32
      %72 = vector.broadcast %cst_30 : f32 to vector<2x128xf32>
      %73 = arith.addf %71, %72 : vector<2x128xf32>
      %74 = arith.mulf %73, %52 : vector<2x128xf32>
      %cst_31 = arith.constant -0.669838607 : f32
      %75 = vector.broadcast %cst_31 : f32 to vector<2x128xf32>
      %76 = arith.addf %74, %75 : vector<2x128xf32>
      %77 = arith.divf %66, %76 : vector<2x128xf32>
      %cst_32 = arith.constant 5.000000e-01 : f32
      %78 = vector.broadcast %cst_32 : f32 to vector<2x128xf32>
      %79 = arith.mulf %78, %52 : vector<2x128xf32>
      %80 = arith.addf %77, %79 : vector<2x128xf32>
      %81 = arith.subf %77, %79 : vector<2x128xf32>
      %c127_i32_33 = arith.constant 127 : i32
      %82 = tpu.dynamic_rotate %81 by %c127_i32_33 dim 1 : vector<2x128xf32>, i32 -> vector<2x128xf32>
      %83 = arith.addf %80, %82 : vector<2x128xf32>
      %cst_34 = arith.constant 5.000000e-01 : f32
      %84 = vector.broadcast %cst_34 : f32 to vector<2x128xf32>
      %85 = arith.mulf %84, %83 : vector<2x128xf32>
      %c1_i32_35 = arith.constant 1 : i32
      %86 = tpu.dynamic_rotate %85 by %c1_i32_35 dim 1 : vector<2x128xf32>, i32 -> vector<2x128xf32>
      %87 = arith.subf %85, %86 : vector<2x128xf32>
      %cst_36 = arith.constant 4.000000e-02 : f32
      %88 = vector.broadcast %cst_36 : f32 to vector<2x128xf32>
      %89 = arith.mulf %88, %87 : vector<2x128xf32>
      %90 = arith.subf %52, %89 : vector<2x128xf32>
      %c127_i32_37 = arith.constant 127 : i32
      %91 = tpu.dynamic_rotate %90 by %c127_i32_37 dim 1 : vector<2x128xf32>, i32 -> vector<2x128xf32>
      %c1_i32_38 = arith.constant 1 : i32
      %92 = tpu.dynamic_rotate %90 by %c1_i32_38 dim 1 : vector<2x128xf32>, i32 -> vector<2x128xf32>
      %93 = arith.select %4, %92, %90 : vector<2x128xi1>, vector<2x128xf32>
      %94 = arith.select %2, %91, %93 : vector<2x128xi1>, vector<2x128xf32>
      %95 = arith.index_cast %c2_i32 : i32 to index
      %c0_39 = arith.constant 0 : index
      %c0_40 = arith.constant 0 : index
      %96 = vector.load %arg2[%95, %c0_39, %c0_40] : memref<8x2x128xf32, #tpu.memory_space<vmem>>, vector<1x2x128xf32>
      %97 = vector.shape_cast %96 : vector<1x2x128xf32> to vector<2x128xf32>
      %98 = vector.shape_cast %94 : vector<2x128xf32> to vector<1x2x128xf32>
      tpu.vector_store %arg2[%95, %c0_39, %c0_40], %98 {strides = array<i32>} : memref<8x2x128xf32, #tpu.memory_space<vmem>>, vector<1x2x128xf32>,
      %c3_i32 = arith.constant 3 : i32
      %cst_41 = arith.constant 1.66186851E-6 : f32
      %99 = vector.broadcast %cst_41 : f32 to vector<2x128xf32>
      %100 = arith.mulf %99, %94 : vector<2x128xf32>
      %cst_42 = arith.constant 0.0200628825 : f32
      %101 = vector.broadcast %cst_42 : f32 to vector<2x128xf32>
      %102 = arith.addf %100, %101 : vector<2x128xf32>
      %103 = arith.mulf %102, %94 : vector<2x128xf32>
      %cst_43 = arith.constant -0.0582602657 : f32
      %104 = vector.broadcast %cst_43 : f32 to vector<2x128xf32>
      %105 = arith.addf %103, %104 : vector<2x128xf32>
      %106 = arith.mulf %105, %94 : vector<2x128xf32>
      %cst_44 = arith.constant 0.0293240696 : f32
      %107 = vector.broadcast %cst_44 : f32 to vector<2x128xf32>
      %108 = arith.addf %106, %107 : vector<2x128xf32>
      %cst_45 = arith.constant -1.72492277E-4 : f32
      %109 = vector.broadcast %cst_45 : f32 to vector<2x128xf32>
      %110 = arith.mulf %109, %94 : vector<2x128xf32>
      %cst_46 = arith.constant -2.08290505 : f32
      %111 = vector.broadcast %cst_46 : f32 to vector<2x128xf32>
      %112 = arith.addf %110, %111 : vector<2x128xf32>
      %113 = arith.mulf %112, %94 : vector<2x128xf32>
      %cst_47 = arith.constant 1.34753656 : f32
      %114 = vector.broadcast %cst_47 : f32 to vector<2x128xf32>
      %115 = arith.addf %113, %114 : vector<2x128xf32>
      %116 = arith.mulf %115, %94 : vector<2x128xf32>
      %cst_48 = arith.constant -0.669838607 : f32
      %117 = vector.broadcast %cst_48 : f32 to vector<2x128xf32>
      %118 = arith.addf %116, %117 : vector<2x128xf32>
      %119 = arith.divf %108, %118 : vector<2x128xf32>
      %cst_49 = arith.constant 5.000000e-01 : f32
      %120 = vector.broadcast %cst_49 : f32 to vector<2x128xf32>
      %121 = arith.mulf %120, %94 : vector<2x128xf32>
      %122 = arith.addf %119, %121 : vector<2x128xf32>
      %123 = arith.subf %119, %121 : vector<2x128xf32>
      %c127_i32_50 = arith.constant 127 : i32
      %124 = tpu.dynamic_rotate %123 by %c127_i32_50 dim 1 : vector<2x128xf32>, i32 -> vector<2x128xf32>
      %125 = arith.addf %122, %124 : vector<2x128xf32>
      %cst_51 = arith.constant 5.000000e-01 : f32
      %126 = vector.broadcast %cst_51 : f32 to vector<2x128xf32>
      %127 = arith.mulf %126, %125 : vector<2x128xf32>
      %c1_i32_52 = arith.constant 1 : i32
      %128 = tpu.dynamic_rotate %127 by %c1_i32_52 dim 1 : vector<2x128xf32>, i32 -> vector<2x128xf32>
      %129 = arith.subf %127, %128 : vector<2x128xf32>
      %cst_53 = arith.constant 4.000000e-02 : f32
      %130 = vector.broadcast %cst_53 : f32 to vector<2x128xf32>
      %131 = arith.mulf %130, %129 : vector<2x128xf32>
      %132 = arith.subf %94, %131 : vector<2x128xf32>
      %c127_i32_54 = arith.constant 127 : i32
      %133 = tpu.dynamic_rotate %132 by %c127_i32_54 dim 1 : vector<2x128xf32>, i32 -> vector<2x128xf32>
      %c1_i32_55 = arith.constant 1 : i32
      %134 = tpu.dynamic_rotate %132 by %c1_i32_55 dim 1 : vector<2x128xf32>, i32 -> vector<2x128xf32>
      %135 = arith.select %4, %134, %132 : vector<2x128xi1>, vector<2x128xf32>
      %136 = arith.select %2, %133, %135 : vector<2x128xi1>, vector<2x128xf32>
      %137 = arith.index_cast %c3_i32 : i32 to index
      %c0_56 = arith.constant 0 : index
      %c0_57 = arith.constant 0 : index
      %138 = vector.load %arg2[%137, %c0_56, %c0_57] : memref<8x2x128xf32, #tpu.memory_space<vmem>>, vector<1x2x128xf32>
      %139 = vector.shape_cast %138 : vector<1x2x128xf32> to vector<2x128xf32>
      %140 = vector.shape_cast %136 : vector<2x128xf32> to vector<1x2x128xf32>
      tpu.vector_store %arg2[%137, %c0_56, %c0_57], %140 {strides = array<i32>} : memref<8x2x128xf32, #tpu.memory_space<vmem>>, vector<1x2x128xf32>,
      %c4_i32 = arith.constant 4 : i32
      %cst_58 = arith.constant 1.66186851E-6 : f32
      %141 = vector.broadcast %cst_58 : f32 to vector<2x128xf32>
      %142 = arith.mulf %141, %136 : vector<2x128xf32>
      %cst_59 = arith.constant 0.0200628825 : f32
      %143 = vector.broadcast %cst_59 : f32 to vector<2x128xf32>
      %144 = arith.addf %142, %143 : vector<2x128xf32>
      %145 = arith.mulf %144, %136 : vector<2x128xf32>
      %cst_60 = arith.constant -0.0582602657 : f32
      %146 = vector.broadcast %cst_60 : f32 to vector<2x128xf32>
      %147 = arith.addf %145, %146 : vector<2x128xf32>
      %148 = arith.mulf %147, %136 : vector<2x128xf32>
      %cst_61 = arith.constant 0.0293240696 : f32
      %149 = vector.broadcast %cst_61 : f32 to vector<2x128xf32>
      %150 = arith.addf %148, %149 : vector<2x128xf32>
      %cst_62 = arith.constant -1.72492277E-4 : f32
      %151 = vector.broadcast %cst_62 : f32 to vector<2x128xf32>
      %152 = arith.mulf %151, %136 : vector<2x128xf32>
      %cst_63 = arith.constant -2.08290505 : f32
      %153 = vector.broadcast %cst_63 : f32 to vector<2x128xf32>
      %154 = arith.addf %152, %153 : vector<2x128xf32>
      %155 = arith.mulf %154, %136 : vector<2x128xf32>
      %cst_64 = arith.constant 1.34753656 : f32
      %156 = vector.broadcast %cst_64 : f32 to vector<2x128xf32>
      %157 = arith.addf %155, %156 : vector<2x128xf32>
      %158 = arith.mulf %157, %136 : vector<2x128xf32>
      %cst_65 = arith.constant -0.669838607 : f32
      %159 = vector.broadcast %cst_65 : f32 to vector<2x128xf32>
      %160 = arith.addf %158, %159 : vector<2x128xf32>
      %161 = arith.divf %150, %160 : vector<2x128xf32>
      %cst_66 = arith.constant 5.000000e-01 : f32
      %162 = vector.broadcast %cst_66 : f32 to vector<2x128xf32>
      %163 = arith.mulf %162, %136 : vector<2x128xf32>
      %164 = arith.addf %161, %163 : vector<2x128xf32>
      %165 = arith.subf %161, %163 : vector<2x128xf32>
      %c127_i32_67 = arith.constant 127 : i32
      %166 = tpu.dynamic_rotate %165 by %c127_i32_67 dim 1 : vector<2x128xf32>, i32 -> vector<2x128xf32>
      %167 = arith.addf %164, %166 : vector<2x128xf32>
      %cst_68 = arith.constant 5.000000e-01 : f32
      %168 = vector.broadcast %cst_68 : f32 to vector<2x128xf32>
      %169 = arith.mulf %168, %167 : vector<2x128xf32>
      %c1_i32_69 = arith.constant 1 : i32
      %170 = tpu.dynamic_rotate %169 by %c1_i32_69 dim 1 : vector<2x128xf32>, i32 -> vector<2x128xf32>
      %171 = arith.subf %169, %170 : vector<2x128xf32>
      %cst_70 = arith.constant 4.000000e-02 : f32
      %172 = vector.broadcast %cst_70 : f32 to vector<2x128xf32>
      %173 = arith.mulf %172, %171 : vector<2x128xf32>
      %174 = arith.subf %136, %173 : vector<2x128xf32>
      %c127_i32_71 = arith.constant 127 : i32
      %175 = tpu.dynamic_rotate %174 by %c127_i32_71 dim 1 : vector<2x128xf32>, i32 -> vector<2x128xf32>
      %c1_i32_72 = arith.constant 1 : i32
      %176 = tpu.dynamic_rotate %174 by %c1_i32_72 dim 1 : vector<2x128xf32>, i32 -> vector<2x128xf32>
      %177 = arith.select %4, %176, %174 : vector<2x128xi1>, vector<2x128xf32>
      %178 = arith.select %2, %175, %177 : vector<2x128xi1>, vector<2x128xf32>
      %179 = arith.index_cast %c4_i32 : i32 to index
      %c0_73 = arith.constant 0 : index
      %c0_74 = arith.constant 0 : index
      %180 = vector.load %arg2[%179, %c0_73, %c0_74] : memref<8x2x128xf32, #tpu.memory_space<vmem>>, vector<1x2x128xf32>
      %181 = vector.shape_cast %180 : vector<1x2x128xf32> to vector<2x128xf32>
      %182 = vector.shape_cast %178 : vector<2x128xf32> to vector<1x2x128xf32>
      tpu.vector_store %arg2[%179, %c0_73, %c0_74], %182 {strides = array<i32>} : memref<8x2x128xf32, #tpu.memory_space<vmem>>, vector<1x2x128xf32>,
      %c5_i32 = arith.constant 5 : i32
      %cst_75 = arith.constant 1.66186851E-6 : f32
      %183 = vector.broadcast %cst_75 : f32 to vector<2x128xf32>
      %184 = arith.mulf %183, %178 : vector<2x128xf32>
      %cst_76 = arith.constant 0.0200628825 : f32
      %185 = vector.broadcast %cst_76 : f32 to vector<2x128xf32>
      %186 = arith.addf %184, %185 : vector<2x128xf32>
      %187 = arith.mulf %186, %178 : vector<2x128xf32>
      %cst_77 = arith.constant -0.0582602657 : f32
      %188 = vector.broadcast %cst_77 : f32 to vector<2x128xf32>
      %189 = arith.addf %187, %188 : vector<2x128xf32>
      %190 = arith.mulf %189, %178 : vector<2x128xf32>
      %cst_78 = arith.constant 0.0293240696 : f32
      %191 = vector.broadcast %cst_78 : f32 to vector<2x128xf32>
      %192 = arith.addf %190, %191 : vector<2x128xf32>
      %cst_79 = arith.constant -1.72492277E-4 : f32
      %193 = vector.broadcast %cst_79 : f32 to vector<2x128xf32>
      %194 = arith.mulf %193, %178 : vector<2x128xf32>
      %cst_80 = arith.constant -2.08290505 : f32
      %195 = vector.broadcast %cst_80 : f32 to vector<2x128xf32>
      %196 = arith.addf %194, %195 : vector<2x128xf32>
      %197 = arith.mulf %196, %178 : vector<2x128xf32>
      %cst_81 = arith.constant 1.34753656 : f32
      %198 = vector.broadcast %cst_81 : f32 to vector<2x128xf32>
      %199 = arith.addf %197, %198 : vector<2x128xf32>
      %200 = arith.mulf %199, %178 : vector<2x128xf32>
      %cst_82 = arith.constant -0.669838607 : f32
      %201 = vector.broadcast %cst_82 : f32 to vector<2x128xf32>
      %202 = arith.addf %200, %201 : vector<2x128xf32>
      %203 = arith.divf %192, %202 : vector<2x128xf32>
      %cst_83 = arith.constant 5.000000e-01 : f32
      %204 = vector.broadcast %cst_83 : f32 to vector<2x128xf32>
      %205 = arith.mulf %204, %178 : vector<2x128xf32>
      %206 = arith.addf %203, %205 : vector<2x128xf32>
      %207 = arith.subf %203, %205 : vector<2x128xf32>
      %c127_i32_84 = arith.constant 127 : i32
      %208 = tpu.dynamic_rotate %207 by %c127_i32_84 dim 1 : vector<2x128xf32>, i32 -> vector<2x128xf32>
      %209 = arith.addf %206, %208 : vector<2x128xf32>
      %cst_85 = arith.constant 5.000000e-01 : f32
      %210 = vector.broadcast %cst_85 : f32 to vector<2x128xf32>
      %211 = arith.mulf %210, %209 : vector<2x128xf32>
      %c1_i32_86 = arith.constant 1 : i32
      %212 = tpu.dynamic_rotate %211 by %c1_i32_86 dim 1 : vector<2x128xf32>, i32 -> vector<2x128xf32>
      %213 = arith.subf %211, %212 : vector<2x128xf32>
      %cst_87 = arith.constant 4.000000e-02 : f32
      %214 = vector.broadcast %cst_87 : f32 to vector<2x128xf32>
      %215 = arith.mulf %214, %213 : vector<2x128xf32>
      %216 = arith.subf %178, %215 : vector<2x128xf32>
      %c127_i32_88 = arith.constant 127 : i32
      %217 = tpu.dynamic_rotate %216 by %c127_i32_88 dim 1 : vector<2x128xf32>, i32 -> vector<2x128xf32>
      %c1_i32_89 = arith.constant 1 : i32
      %218 = tpu.dynamic_rotate %216 by %c1_i32_89 dim 1 : vector<2x128xf32>, i32 -> vector<2x128xf32>
      %219 = arith.select %4, %218, %216 : vector<2x128xi1>, vector<2x128xf32>
      %220 = arith.select %2, %217, %219 : vector<2x128xi1>, vector<2x128xf32>
      %221 = arith.index_cast %c5_i32 : i32 to index
      %c0_90 = arith.constant 0 : index
      %c0_91 = arith.constant 0 : index
      %222 = vector.load %arg2[%221, %c0_90, %c0_91] : memref<8x2x128xf32, #tpu.memory_space<vmem>>, vector<1x2x128xf32>
      %223 = vector.shape_cast %222 : vector<1x2x128xf32> to vector<2x128xf32>
      %224 = vector.shape_cast %220 : vector<2x128xf32> to vector<1x2x128xf32>
      tpu.vector_store %arg2[%221, %c0_90, %c0_91], %224 {strides = array<i32>} : memref<8x2x128xf32, #tpu.memory_space<vmem>>, vector<1x2x128xf32>,
      %c6_i32 = arith.constant 6 : i32
      %cst_92 = arith.constant 1.66186851E-6 : f32
      %225 = vector.broadcast %cst_92 : f32 to vector<2x128xf32>
      %226 = arith.mulf %225, %220 : vector<2x128xf32>
      %cst_93 = arith.constant 0.0200628825 : f32
      %227 = vector.broadcast %cst_93 : f32 to vector<2x128xf32>
      %228 = arith.addf %226, %227 : vector<2x128xf32>
      %229 = arith.mulf %228, %220 : vector<2x128xf32>
      %cst_94 = arith.constant -0.0582602657 : f32
      %230 = vector.broadcast %cst_94 : f32 to vector<2x128xf32>
      %231 = arith.addf %229, %230 : vector<2x128xf32>
      %232 = arith.mulf %231, %220 : vector<2x128xf32>
      %cst_95 = arith.constant 0.0293240696 : f32
      %233 = vector.broadcast %cst_95 : f32 to vector<2x128xf32>
      %234 = arith.addf %232, %233 : vector<2x128xf32>
      %cst_96 = arith.constant -1.72492277E-4 : f32
      %235 = vector.broadcast %cst_96 : f32 to vector<2x128xf32>
      %236 = arith.mulf %235, %220 : vector<2x128xf32>
      %cst_97 = arith.constant -2.08290505 : f32
      %237 = vector.broadcast %cst_97 : f32 to vector<2x128xf32>
      %238 = arith.addf %236, %237 : vector<2x128xf32>
      %239 = arith.mulf %238, %220 : vector<2x128xf32>
      %cst_98 = arith.constant 1.34753656 : f32
      %240 = vector.broadcast %cst_98 : f32 to vector<2x128xf32>
      %241 = arith.addf %239, %240 : vector<2x128xf32>
      %242 = arith.mulf %241, %220 : vector<2x128xf32>
      %cst_99 = arith.constant -0.669838607 : f32
      %243 = vector.broadcast %cst_99 : f32 to vector<2x128xf32>
      %244 = arith.addf %242, %243 : vector<2x128xf32>
      %245 = arith.divf %234, %244 : vector<2x128xf32>
      %cst_100 = arith.constant 5.000000e-01 : f32
      %246 = vector.broadcast %cst_100 : f32 to vector<2x128xf32>
      %247 = arith.mulf %246, %220 : vector<2x128xf32>
      %248 = arith.addf %245, %247 : vector<2x128xf32>
      %249 = arith.subf %245, %247 : vector<2x128xf32>
      %c127_i32_101 = arith.constant 127 : i32
      %250 = tpu.dynamic_rotate %249 by %c127_i32_101 dim 1 : vector<2x128xf32>, i32 -> vector<2x128xf32>
      %251 = arith.addf %248, %250 : vector<2x128xf32>
      %cst_102 = arith.constant 5.000000e-01 : f32
      %252 = vector.broadcast %cst_102 : f32 to vector<2x128xf32>
      %253 = arith.mulf %252, %251 : vector<2x128xf32>
      %c1_i32_103 = arith.constant 1 : i32
      %254 = tpu.dynamic_rotate %253 by %c1_i32_103 dim 1 : vector<2x128xf32>, i32 -> vector<2x128xf32>
      %255 = arith.subf %253, %254 : vector<2x128xf32>
      %cst_104 = arith.constant 4.000000e-02 : f32
      %256 = vector.broadcast %cst_104 : f32 to vector<2x128xf32>
      %257 = arith.mulf %256, %255 : vector<2x128xf32>
      %258 = arith.subf %220, %257 : vector<2x128xf32>
      %c127_i32_105 = arith.constant 127 : i32
      %259 = tpu.dynamic_rotate %258 by %c127_i32_105 dim 1 : vector<2x128xf32>, i32 -> vector<2x128xf32>
      %c1_i32_106 = arith.constant 1 : i32
      %260 = tpu.dynamic_rotate %258 by %c1_i32_106 dim 1 : vector<2x128xf32>, i32 -> vector<2x128xf32>
      %261 = arith.select %4, %260, %258 : vector<2x128xi1>, vector<2x128xf32>
      %262 = arith.select %2, %259, %261 : vector<2x128xi1>, vector<2x128xf32>
      %263 = arith.index_cast %c6_i32 : i32 to index
      %c0_107 = arith.constant 0 : index
      %c0_108 = arith.constant 0 : index
      %264 = vector.load %arg2[%263, %c0_107, %c0_108] : memref<8x2x128xf32, #tpu.memory_space<vmem>>, vector<1x2x128xf32>
      %265 = vector.shape_cast %264 : vector<1x2x128xf32> to vector<2x128xf32>
      %266 = vector.shape_cast %262 : vector<2x128xf32> to vector<1x2x128xf32>
      tpu.vector_store %arg2[%263, %c0_107, %c0_108], %266 {strides = array<i32>} : memref<8x2x128xf32, #tpu.memory_space<vmem>>, vector<1x2x128xf32>,
      %c7_i32 = arith.constant 7 : i32
      %cst_109 = arith.constant 1.66186851E-6 : f32
      %267 = vector.broadcast %cst_109 : f32 to vector<2x128xf32>
      %268 = arith.mulf %267, %262 : vector<2x128xf32>
      %cst_110 = arith.constant 0.0200628825 : f32
      %269 = vector.broadcast %cst_110 : f32 to vector<2x128xf32>
      %270 = arith.addf %268, %269 : vector<2x128xf32>
      %271 = arith.mulf %270, %262 : vector<2x128xf32>
      %cst_111 = arith.constant -0.0582602657 : f32
      %272 = vector.broadcast %cst_111 : f32 to vector<2x128xf32>
      %273 = arith.addf %271, %272 : vector<2x128xf32>
      %274 = arith.mulf %273, %262 : vector<2x128xf32>
      %cst_112 = arith.constant 0.0293240696 : f32
      %275 = vector.broadcast %cst_112 : f32 to vector<2x128xf32>
      %276 = arith.addf %274, %275 : vector<2x128xf32>
      %cst_113 = arith.constant -1.72492277E-4 : f32
      %277 = vector.broadcast %cst_113 : f32 to vector<2x128xf32>
      %278 = arith.mulf %277, %262 : vector<2x128xf32>
      %cst_114 = arith.constant -2.08290505 : f32
      %279 = vector.broadcast %cst_114 : f32 to vector<2x128xf32>
      %280 = arith.addf %278, %279 : vector<2x128xf32>
      %281 = arith.mulf %280, %262 : vector<2x128xf32>
      %cst_115 = arith.constant 1.34753656 : f32
      %282 = vector.broadcast %cst_115 : f32 to vector<2x128xf32>
      %283 = arith.addf %281, %282 : vector<2x128xf32>
      %284 = arith.mulf %283, %262 : vector<2x128xf32>
      %cst_116 = arith.constant -0.669838607 : f32
      %285 = vector.broadcast %cst_116 : f32 to vector<2x128xf32>
      %286 = arith.addf %284, %285 : vector<2x128xf32>
      %287 = arith.divf %276, %286 : vector<2x128xf32>
      %cst_117 = arith.constant 5.000000e-01 : f32
      %288 = vector.broadcast %cst_117 : f32 to vector<2x128xf32>
      %289 = arith.mulf %288, %262 : vector<2x128xf32>
      %290 = arith.addf %287, %289 : vector<2x128xf32>
      %291 = arith.subf %287, %289 : vector<2x128xf32>
      %c127_i32_118 = arith.constant 127 : i32
      %292 = tpu.dynamic_rotate %291 by %c127_i32_118 dim 1 : vector<2x128xf32>, i32 -> vector<2x128xf32>
      %293 = arith.addf %290, %292 : vector<2x128xf32>
      %cst_119 = arith.constant 5.000000e-01 : f32
      %294 = vector.broadcast %cst_119 : f32 to vector<2x128xf32>
      %295 = arith.mulf %294, %293 : vector<2x128xf32>
      %c1_i32_120 = arith.constant 1 : i32
      %296 = tpu.dynamic_rotate %295 by %c1_i32_120 dim 1 : vector<2x128xf32>, i32 -> vector<2x128xf32>
      %297 = arith.subf %295, %296 : vector<2x128xf32>
      %cst_121 = arith.constant 4.000000e-02 : f32
      %298 = vector.broadcast %cst_121 : f32 to vector<2x128xf32>
      %299 = arith.mulf %298, %297 : vector<2x128xf32>
      %300 = arith.subf %262, %299 : vector<2x128xf32>
      %c127_i32_122 = arith.constant 127 : i32
      %301 = tpu.dynamic_rotate %300 by %c127_i32_122 dim 1 : vector<2x128xf32>, i32 -> vector<2x128xf32>
      %c1_i32_123 = arith.constant 1 : i32
      %302 = tpu.dynamic_rotate %300 by %c1_i32_123 dim 1 : vector<2x128xf32>, i32 -> vector<2x128xf32>
      %303 = arith.select %4, %302, %300 : vector<2x128xi1>, vector<2x128xf32>
      %304 = arith.select %2, %301, %303 : vector<2x128xi1>, vector<2x128xf32>
      %305 = arith.index_cast %c7_i32 : i32 to index
      %c0_124 = arith.constant 0 : index
      %c0_125 = arith.constant 0 : index
      %306 = vector.load %arg2[%305, %c0_124, %c0_125] : memref<8x2x128xf32, #tpu.memory_space<vmem>>, vector<1x2x128xf32>
      %307 = vector.shape_cast %306 : vector<1x2x128xf32> to vector<2x128xf32>
      %308 = vector.shape_cast %304 : vector<2x128xf32> to vector<1x2x128xf32>
      tpu.vector_store %arg2[%305, %c0_124, %c0_125], %308 {strides = array<i32>} : memref<8x2x128xf32, #tpu.memory_space<vmem>>, vector<1x2x128xf32>,
      %c7_i32_126 = arith.constant 7 : i32
      %c0_127 = arith.constant 0 : index
      %c0_128 = arith.constant 0 : index
      %309 = vector.load %arg3[%c0_127, %c0_128] : memref<2x128xf32, #tpu.memory_space<vmem>>, vector<2x128xf32>
      tpu.vector_store %arg3[%c0_127, %c0_128], %304 {strides = array<i32>} : memref<2x128xf32, #tpu.memory_space<vmem>>, vector<2x128xf32>,
    } else {
    }
    %c0_i32_2 = arith.constant 0 : i32
    %8 = arith.cmpi sgt, %arg0, %c0_i32_2 : i32
    %9 = arith.extui %8 : i1 to i32
    %c0_i32_3 = arith.constant 0 : i32
    %10 = arith.cmpi ne, %9, %c0_i32_3 : i32
    scf.if %10 {
      %c0 = arith.constant 0 : index
      %c0_4 = arith.constant 0 : index
      %11 = vector.load %arg3[%c0, %c0_4] : memref<2x128xf32, #tpu.memory_space<vmem>>, vector<2x128xf32>
      %c0_i32_5 = arith.constant 0 : i32
      %cst = arith.constant 1.66186851E-6 : f32
      %12 = vector.broadcast %cst : f32 to vector<2x128xf32>
      %13 = arith.mulf %12, %11 : vector<2x128xf32>
      %cst_6 = arith.constant 0.0200628825 : f32
      %14 = vector.broadcast %cst_6 : f32 to vector<2x128xf32>
      %15 = arith.addf %13, %14 : vector<2x128xf32>
      %16 = arith.mulf %15, %11 : vector<2x128xf32>
      %cst_7 = arith.constant -0.0582602657 : f32
      %17 = vector.broadcast %cst_7 : f32 to vector<2x128xf32>
      %18 = arith.addf %16, %17 : vector<2x128xf32>
      %19 = arith.mulf %18, %11 : vector<2x128xf32>
      %cst_8 = arith.constant 0.0293240696 : f32
      %20 = vector.broadcast %cst_8 : f32 to vector<2x128xf32>
      %21 = arith.addf %19, %20 : vector<2x128xf32>
      %cst_9 = arith.constant -1.72492277E-4 : f32
      %22 = vector.broadcast %cst_9 : f32 to vector<2x128xf32>
      %23 = arith.mulf %22, %11 : vector<2x128xf32>
      %cst_10 = arith.constant -2.08290505 : f32
      %24 = vector.broadcast %cst_10 : f32 to vector<2x128xf32>
      %25 = arith.addf %23, %24 : vector<2x128xf32>
      %26 = arith.mulf %25, %11 : vector<2x128xf32>
      %cst_11 = arith.constant 1.34753656 : f32
      %27 = vector.broadcast %cst_11 : f32 to vector<2x128xf32>
      %28 = arith.addf %26, %27 : vector<2x128xf32>
      %29 = arith.mulf %28, %11 : vector<2x128xf32>
      %cst_12 = arith.constant -0.669838607 : f32
      %30 = vector.broadcast %cst_12 : f32 to vector<2x128xf32>
      %31 = arith.addf %29, %30 : vector<2x128xf32>
      %32 = arith.divf %21, %31 : vector<2x128xf32>
      %cst_13 = arith.constant 5.000000e-01 : f32
      %33 = vector.broadcast %cst_13 : f32 to vector<2x128xf32>
      %34 = arith.mulf %33, %11 : vector<2x128xf32>
      %35 = arith.addf %32, %34 : vector<2x128xf32>
      %36 = arith.subf %32, %34 : vector<2x128xf32>
      %c127_i32_14 = arith.constant 127 : i32
      %37 = tpu.dynamic_rotate %36 by %c127_i32_14 dim 1 : vector<2x128xf32>, i32 -> vector<2x128xf32>
      %38 = arith.addf %35, %37 : vector<2x128xf32>
      %cst_15 = arith.constant 5.000000e-01 : f32
      %39 = vector.broadcast %cst_15 : f32 to vector<2x128xf32>
      %40 = arith.mulf %39, %38 : vector<2x128xf32>
      %c1_i32 = arith.constant 1 : i32
      %41 = tpu.dynamic_rotate %40 by %c1_i32 dim 1 : vector<2x128xf32>, i32 -> vector<2x128xf32>
      %42 = arith.subf %40, %41 : vector<2x128xf32>
      %cst_16 = arith.constant 4.000000e-02 : f32
      %43 = vector.broadcast %cst_16 : f32 to vector<2x128xf32>
      %44 = arith.mulf %43, %42 : vector<2x128xf32>
      %45 = arith.subf %11, %44 : vector<2x128xf32>
      %c127_i32_17 = arith.constant 127 : i32
      %46 = tpu.dynamic_rotate %45 by %c127_i32_17 dim 1 : vector<2x128xf32>, i32 -> vector<2x128xf32>
      %c1_i32_18 = arith.constant 1 : i32
      %47 = tpu.dynamic_rotate %45 by %c1_i32_18 dim 1 : vector<2x128xf32>, i32 -> vector<2x128xf32>
      %48 = arith.select %4, %47, %45 : vector<2x128xi1>, vector<2x128xf32>
      %49 = arith.select %2, %46, %48 : vector<2x128xi1>, vector<2x128xf32>
      %50 = arith.index_cast %c0_i32_5 : i32 to index
      %c0_19 = arith.constant 0 : index
      %c0_20 = arith.constant 0 : index
      %51 = vector.load %arg2[%50, %c0_19, %c0_20] : memref<8x2x128xf32, #tpu.memory_space<vmem>>, vector<1x2x128xf32>
      %52 = vector.shape_cast %51 : vector<1x2x128xf32> to vector<2x128xf32>
      %53 = vector.shape_cast %49 : vector<2x128xf32> to vector<1x2x128xf32>
      tpu.vector_store %arg2[%50, %c0_19, %c0_20], %53 {strides = array<i32>} : memref<8x2x128xf32, #tpu.memory_space<vmem>>, vector<1x2x128xf32>,
      %c1_i32_21 = arith.constant 1 : i32
      %cst_22 = arith.constant 1.66186851E-6 : f32
      %54 = vector.broadcast %cst_22 : f32 to vector<2x128xf32>
      %55 = arith.mulf %54, %49 : vector<2x128xf32>
      %cst_23 = arith.constant 0.0200628825 : f32
      %56 = vector.broadcast %cst_23 : f32 to vector<2x128xf32>
      %57 = arith.addf %55, %56 : vector<2x128xf32>
      %58 = arith.mulf %57, %49 : vector<2x128xf32>
      %cst_24 = arith.constant -0.0582602657 : f32
      %59 = vector.broadcast %cst_24 : f32 to vector<2x128xf32>
      %60 = arith.addf %58, %59 : vector<2x128xf32>
      %61 = arith.mulf %60, %49 : vector<2x128xf32>
      %cst_25 = arith.constant 0.0293240696 : f32
      %62 = vector.broadcast %cst_25 : f32 to vector<2x128xf32>
      %63 = arith.addf %61, %62 : vector<2x128xf32>
      %cst_26 = arith.constant -1.72492277E-4 : f32
      %64 = vector.broadcast %cst_26 : f32 to vector<2x128xf32>
      %65 = arith.mulf %64, %49 : vector<2x128xf32>
      %cst_27 = arith.constant -2.08290505 : f32
      %66 = vector.broadcast %cst_27 : f32 to vector<2x128xf32>
      %67 = arith.addf %65, %66 : vector<2x128xf32>
      %68 = arith.mulf %67, %49 : vector<2x128xf32>
      %cst_28 = arith.constant 1.34753656 : f32
      %69 = vector.broadcast %cst_28 : f32 to vector<2x128xf32>
      %70 = arith.addf %68, %69 : vector<2x128xf32>
      %71 = arith.mulf %70, %49 : vector<2x128xf32>
      %cst_29 = arith.constant -0.669838607 : f32
      %72 = vector.broadcast %cst_29 : f32 to vector<2x128xf32>
      %73 = arith.addf %71, %72 : vector<2x128xf32>
      %74 = arith.divf %63, %73 : vector<2x128xf32>
      %cst_30 = arith.constant 5.000000e-01 : f32
      %75 = vector.broadcast %cst_30 : f32 to vector<2x128xf32>
      %76 = arith.mulf %75, %49 : vector<2x128xf32>
      %77 = arith.addf %74, %76 : vector<2x128xf32>
      %78 = arith.subf %74, %76 : vector<2x128xf32>
      %c127_i32_31 = arith.constant 127 : i32
      %79 = tpu.dynamic_rotate %78 by %c127_i32_31 dim 1 : vector<2x128xf32>, i32 -> vector<2x128xf32>
      %80 = arith.addf %77, %79 : vector<2x128xf32>
      %cst_32 = arith.constant 5.000000e-01 : f32
      %81 = vector.broadcast %cst_32 : f32 to vector<2x128xf32>
      %82 = arith.mulf %81, %80 : vector<2x128xf32>
      %c1_i32_33 = arith.constant 1 : i32
      %83 = tpu.dynamic_rotate %82 by %c1_i32_33 dim 1 : vector<2x128xf32>, i32 -> vector<2x128xf32>
      %84 = arith.subf %82, %83 : vector<2x128xf32>
      %cst_34 = arith.constant 4.000000e-02 : f32
      %85 = vector.broadcast %cst_34 : f32 to vector<2x128xf32>
      %86 = arith.mulf %85, %84 : vector<2x128xf32>
      %87 = arith.subf %49, %86 : vector<2x128xf32>
      %c127_i32_35 = arith.constant 127 : i32
      %88 = tpu.dynamic_rotate %87 by %c127_i32_35 dim 1 : vector<2x128xf32>, i32 -> vector<2x128xf32>
      %c1_i32_36 = arith.constant 1 : i32
      %89 = tpu.dynamic_rotate %87 by %c1_i32_36 dim 1 : vector<2x128xf32>, i32 -> vector<2x128xf32>
      %90 = arith.select %4, %89, %87 : vector<2x128xi1>, vector<2x128xf32>
      %91 = arith.select %2, %88, %90 : vector<2x128xi1>, vector<2x128xf32>
      %92 = arith.index_cast %c1_i32_21 : i32 to index
      %c0_37 = arith.constant 0 : index
      %c0_38 = arith.constant 0 : index
      %93 = vector.load %arg2[%92, %c0_37, %c0_38] : memref<8x2x128xf32, #tpu.memory_space<vmem>>, vector<1x2x128xf32>
      %94 = vector.shape_cast %93 : vector<1x2x128xf32> to vector<2x128xf32>
      %95 = vector.shape_cast %91 : vector<2x128xf32> to vector<1x2x128xf32>
      tpu.vector_store %arg2[%92, %c0_37, %c0_38], %95 {strides = array<i32>} : memref<8x2x128xf32, #tpu.memory_space<vmem>>, vector<1x2x128xf32>,
      %c2_i32 = arith.constant 2 : i32
      %cst_39 = arith.constant 1.66186851E-6 : f32
      %96 = vector.broadcast %cst_39 : f32 to vector<2x128xf32>
      %97 = arith.mulf %96, %91 : vector<2x128xf32>
      %cst_40 = arith.constant 0.0200628825 : f32
      %98 = vector.broadcast %cst_40 : f32 to vector<2x128xf32>
      %99 = arith.addf %97, %98 : vector<2x128xf32>
      %100 = arith.mulf %99, %91 : vector<2x128xf32>
      %cst_41 = arith.constant -0.0582602657 : f32
      %101 = vector.broadcast %cst_41 : f32 to vector<2x128xf32>
      %102 = arith.addf %100, %101 : vector<2x128xf32>
      %103 = arith.mulf %102, %91 : vector<2x128xf32>
      %cst_42 = arith.constant 0.0293240696 : f32
      %104 = vector.broadcast %cst_42 : f32 to vector<2x128xf32>
      %105 = arith.addf %103, %104 : vector<2x128xf32>
      %cst_43 = arith.constant -1.72492277E-4 : f32
      %106 = vector.broadcast %cst_43 : f32 to vector<2x128xf32>
      %107 = arith.mulf %106, %91 : vector<2x128xf32>
      %cst_44 = arith.constant -2.08290505 : f32
      %108 = vector.broadcast %cst_44 : f32 to vector<2x128xf32>
      %109 = arith.addf %107, %108 : vector<2x128xf32>
      %110 = arith.mulf %109, %91 : vector<2x128xf32>
      %cst_45 = arith.constant 1.34753656 : f32
      %111 = vector.broadcast %cst_45 : f32 to vector<2x128xf32>
      %112 = arith.addf %110, %111 : vector<2x128xf32>
      %113 = arith.mulf %112, %91 : vector<2x128xf32>
      %cst_46 = arith.constant -0.669838607 : f32
      %114 = vector.broadcast %cst_46 : f32 to vector<2x128xf32>
      %115 = arith.addf %113, %114 : vector<2x128xf32>
      %116 = arith.divf %105, %115 : vector<2x128xf32>
      %cst_47 = arith.constant 5.000000e-01 : f32
      %117 = vector.broadcast %cst_47 : f32 to vector<2x128xf32>
      %118 = arith.mulf %117, %91 : vector<2x128xf32>
      %119 = arith.addf %116, %118 : vector<2x128xf32>
      %120 = arith.subf %116, %118 : vector<2x128xf32>
      %c127_i32_48 = arith.constant 127 : i32
      %121 = tpu.dynamic_rotate %120 by %c127_i32_48 dim 1 : vector<2x128xf32>, i32 -> vector<2x128xf32>
      %122 = arith.addf %119, %121 : vector<2x128xf32>
      %cst_49 = arith.constant 5.000000e-01 : f32
      %123 = vector.broadcast %cst_49 : f32 to vector<2x128xf32>
      %124 = arith.mulf %123, %122 : vector<2x128xf32>
      %c1_i32_50 = arith.constant 1 : i32
      %125 = tpu.dynamic_rotate %124 by %c1_i32_50 dim 1 : vector<2x128xf32>, i32 -> vector<2x128xf32>
      %126 = arith.subf %124, %125 : vector<2x128xf32>
      %cst_51 = arith.constant 4.000000e-02 : f32
      %127 = vector.broadcast %cst_51 : f32 to vector<2x128xf32>
      %128 = arith.mulf %127, %126 : vector<2x128xf32>
      %129 = arith.subf %91, %128 : vector<2x128xf32>
      %c127_i32_52 = arith.constant 127 : i32
      %130 = tpu.dynamic_rotate %129 by %c127_i32_52 dim 1 : vector<2x128xf32>, i32 -> vector<2x128xf32>
      %c1_i32_53 = arith.constant 1 : i32
      %131 = tpu.dynamic_rotate %129 by %c1_i32_53 dim 1 : vector<2x128xf32>, i32 -> vector<2x128xf32>
      %132 = arith.select %4, %131, %129 : vector<2x128xi1>, vector<2x128xf32>
      %133 = arith.select %2, %130, %132 : vector<2x128xi1>, vector<2x128xf32>
      %134 = arith.index_cast %c2_i32 : i32 to index
      %c0_54 = arith.constant 0 : index
      %c0_55 = arith.constant 0 : index
      %135 = vector.load %arg2[%134, %c0_54, %c0_55] : memref<8x2x128xf32, #tpu.memory_space<vmem>>, vector<1x2x128xf32>
      %136 = vector.shape_cast %135 : vector<1x2x128xf32> to vector<2x128xf32>
      %137 = vector.shape_cast %133 : vector<2x128xf32> to vector<1x2x128xf32>
      tpu.vector_store %arg2[%134, %c0_54, %c0_55], %137 {strides = array<i32>} : memref<8x2x128xf32, #tpu.memory_space<vmem>>, vector<1x2x128xf32>,
      %c3_i32 = arith.constant 3 : i32
      %cst_56 = arith.constant 1.66186851E-6 : f32
      %138 = vector.broadcast %cst_56 : f32 to vector<2x128xf32>
      %139 = arith.mulf %138, %133 : vector<2x128xf32>
      %cst_57 = arith.constant 0.0200628825 : f32
      %140 = vector.broadcast %cst_57 : f32 to vector<2x128xf32>
      %141 = arith.addf %139, %140 : vector<2x128xf32>
      %142 = arith.mulf %141, %133 : vector<2x128xf32>
      %cst_58 = arith.constant -0.0582602657 : f32
      %143 = vector.broadcast %cst_58 : f32 to vector<2x128xf32>
      %144 = arith.addf %142, %143 : vector<2x128xf32>
      %145 = arith.mulf %144, %133 : vector<2x128xf32>
      %cst_59 = arith.constant 0.0293240696 : f32
      %146 = vector.broadcast %cst_59 : f32 to vector<2x128xf32>
      %147 = arith.addf %145, %146 : vector<2x128xf32>
      %cst_60 = arith.constant -1.72492277E-4 : f32
      %148 = vector.broadcast %cst_60 : f32 to vector<2x128xf32>
      %149 = arith.mulf %148, %133 : vector<2x128xf32>
      %cst_61 = arith.constant -2.08290505 : f32
      %150 = vector.broadcast %cst_61 : f32 to vector<2x128xf32>
      %151 = arith.addf %149, %150 : vector<2x128xf32>
      %152 = arith.mulf %151, %133 : vector<2x128xf32>
      %cst_62 = arith.constant 1.34753656 : f32
      %153 = vector.broadcast %cst_62 : f32 to vector<2x128xf32>
      %154 = arith.addf %152, %153 : vector<2x128xf32>
      %155 = arith.mulf %154, %133 : vector<2x128xf32>
      %cst_63 = arith.constant -0.669838607 : f32
      %156 = vector.broadcast %cst_63 : f32 to vector<2x128xf32>
      %157 = arith.addf %155, %156 : vector<2x128xf32>
      %158 = arith.divf %147, %157 : vector<2x128xf32>
      %cst_64 = arith.constant 5.000000e-01 : f32
      %159 = vector.broadcast %cst_64 : f32 to vector<2x128xf32>
      %160 = arith.mulf %159, %133 : vector<2x128xf32>
      %161 = arith.addf %158, %160 : vector<2x128xf32>
      %162 = arith.subf %158, %160 : vector<2x128xf32>
      %c127_i32_65 = arith.constant 127 : i32
      %163 = tpu.dynamic_rotate %162 by %c127_i32_65 dim 1 : vector<2x128xf32>, i32 -> vector<2x128xf32>
      %164 = arith.addf %161, %163 : vector<2x128xf32>
      %cst_66 = arith.constant 5.000000e-01 : f32
      %165 = vector.broadcast %cst_66 : f32 to vector<2x128xf32>
      %166 = arith.mulf %165, %164 : vector<2x128xf32>
      %c1_i32_67 = arith.constant 1 : i32
      %167 = tpu.dynamic_rotate %166 by %c1_i32_67 dim 1 : vector<2x128xf32>, i32 -> vector<2x128xf32>
      %168 = arith.subf %166, %167 : vector<2x128xf32>
      %cst_68 = arith.constant 4.000000e-02 : f32
      %169 = vector.broadcast %cst_68 : f32 to vector<2x128xf32>
      %170 = arith.mulf %169, %168 : vector<2x128xf32>
      %171 = arith.subf %133, %170 : vector<2x128xf32>
      %c127_i32_69 = arith.constant 127 : i32
      %172 = tpu.dynamic_rotate %171 by %c127_i32_69 dim 1 : vector<2x128xf32>, i32 -> vector<2x128xf32>
      %c1_i32_70 = arith.constant 1 : i32
      %173 = tpu.dynamic_rotate %171 by %c1_i32_70 dim 1 : vector<2x128xf32>, i32 -> vector<2x128xf32>
      %174 = arith.select %4, %173, %171 : vector<2x128xi1>, vector<2x128xf32>
      %175 = arith.select %2, %172, %174 : vector<2x128xi1>, vector<2x128xf32>
      %176 = arith.index_cast %c3_i32 : i32 to index
      %c0_71 = arith.constant 0 : index
      %c0_72 = arith.constant 0 : index
      %177 = vector.load %arg2[%176, %c0_71, %c0_72] : memref<8x2x128xf32, #tpu.memory_space<vmem>>, vector<1x2x128xf32>
      %178 = vector.shape_cast %177 : vector<1x2x128xf32> to vector<2x128xf32>
      %179 = vector.shape_cast %175 : vector<2x128xf32> to vector<1x2x128xf32>
      tpu.vector_store %arg2[%176, %c0_71, %c0_72], %179 {strides = array<i32>} : memref<8x2x128xf32, #tpu.memory_space<vmem>>, vector<1x2x128xf32>,
      %c4_i32 = arith.constant 4 : i32
      %cst_73 = arith.constant 1.66186851E-6 : f32
      %180 = vector.broadcast %cst_73 : f32 to vector<2x128xf32>
      %181 = arith.mulf %180, %175 : vector<2x128xf32>
      %cst_74 = arith.constant 0.0200628825 : f32
      %182 = vector.broadcast %cst_74 : f32 to vector<2x128xf32>
      %183 = arith.addf %181, %182 : vector<2x128xf32>
      %184 = arith.mulf %183, %175 : vector<2x128xf32>
      %cst_75 = arith.constant -0.0582602657 : f32
      %185 = vector.broadcast %cst_75 : f32 to vector<2x128xf32>
      %186 = arith.addf %184, %185 : vector<2x128xf32>
      %187 = arith.mulf %186, %175 : vector<2x128xf32>
      %cst_76 = arith.constant 0.0293240696 : f32
      %188 = vector.broadcast %cst_76 : f32 to vector<2x128xf32>
      %189 = arith.addf %187, %188 : vector<2x128xf32>
      %cst_77 = arith.constant -1.72492277E-4 : f32
      %190 = vector.broadcast %cst_77 : f32 to vector<2x128xf32>
      %191 = arith.mulf %190, %175 : vector<2x128xf32>
      %cst_78 = arith.constant -2.08290505 : f32
      %192 = vector.broadcast %cst_78 : f32 to vector<2x128xf32>
      %193 = arith.addf %191, %192 : vector<2x128xf32>
      %194 = arith.mulf %193, %175 : vector<2x128xf32>
      %cst_79 = arith.constant 1.34753656 : f32
      %195 = vector.broadcast %cst_79 : f32 to vector<2x128xf32>
      %196 = arith.addf %194, %195 : vector<2x128xf32>
      %197 = arith.mulf %196, %175 : vector<2x128xf32>
      %cst_80 = arith.constant -0.669838607 : f32
      %198 = vector.broadcast %cst_80 : f32 to vector<2x128xf32>
      %199 = arith.addf %197, %198 : vector<2x128xf32>
      %200 = arith.divf %189, %199 : vector<2x128xf32>
      %cst_81 = arith.constant 5.000000e-01 : f32
      %201 = vector.broadcast %cst_81 : f32 to vector<2x128xf32>
      %202 = arith.mulf %201, %175 : vector<2x128xf32>
      %203 = arith.addf %200, %202 : vector<2x128xf32>
      %204 = arith.subf %200, %202 : vector<2x128xf32>
      %c127_i32_82 = arith.constant 127 : i32
      %205 = tpu.dynamic_rotate %204 by %c127_i32_82 dim 1 : vector<2x128xf32>, i32 -> vector<2x128xf32>
      %206 = arith.addf %203, %205 : vector<2x128xf32>
      %cst_83 = arith.constant 5.000000e-01 : f32
      %207 = vector.broadcast %cst_83 : f32 to vector<2x128xf32>
      %208 = arith.mulf %207, %206 : vector<2x128xf32>
      %c1_i32_84 = arith.constant 1 : i32
      %209 = tpu.dynamic_rotate %208 by %c1_i32_84 dim 1 : vector<2x128xf32>, i32 -> vector<2x128xf32>
      %210 = arith.subf %208, %209 : vector<2x128xf32>
      %cst_85 = arith.constant 4.000000e-02 : f32
      %211 = vector.broadcast %cst_85 : f32 to vector<2x128xf32>
      %212 = arith.mulf %211, %210 : vector<2x128xf32>
      %213 = arith.subf %175, %212 : vector<2x128xf32>
      %c127_i32_86 = arith.constant 127 : i32
      %214 = tpu.dynamic_rotate %213 by %c127_i32_86 dim 1 : vector<2x128xf32>, i32 -> vector<2x128xf32>
      %c1_i32_87 = arith.constant 1 : i32
      %215 = tpu.dynamic_rotate %213 by %c1_i32_87 dim 1 : vector<2x128xf32>, i32 -> vector<2x128xf32>
      %216 = arith.select %4, %215, %213 : vector<2x128xi1>, vector<2x128xf32>
      %217 = arith.select %2, %214, %216 : vector<2x128xi1>, vector<2x128xf32>
      %218 = arith.index_cast %c4_i32 : i32 to index
      %c0_88 = arith.constant 0 : index
      %c0_89 = arith.constant 0 : index
      %219 = vector.load %arg2[%218, %c0_88, %c0_89] : memref<8x2x128xf32, #tpu.memory_space<vmem>>, vector<1x2x128xf32>
      %220 = vector.shape_cast %219 : vector<1x2x128xf32> to vector<2x128xf32>
      %221 = vector.shape_cast %217 : vector<2x128xf32> to vector<1x2x128xf32>
      tpu.vector_store %arg2[%218, %c0_88, %c0_89], %221 {strides = array<i32>} : memref<8x2x128xf32, #tpu.memory_space<vmem>>, vector<1x2x128xf32>,
      %c5_i32 = arith.constant 5 : i32
      %cst_90 = arith.constant 1.66186851E-6 : f32
      %222 = vector.broadcast %cst_90 : f32 to vector<2x128xf32>
      %223 = arith.mulf %222, %217 : vector<2x128xf32>
      %cst_91 = arith.constant 0.0200628825 : f32
      %224 = vector.broadcast %cst_91 : f32 to vector<2x128xf32>
      %225 = arith.addf %223, %224 : vector<2x128xf32>
      %226 = arith.mulf %225, %217 : vector<2x128xf32>
      %cst_92 = arith.constant -0.0582602657 : f32
      %227 = vector.broadcast %cst_92 : f32 to vector<2x128xf32>
      %228 = arith.addf %226, %227 : vector<2x128xf32>
      %229 = arith.mulf %228, %217 : vector<2x128xf32>
      %cst_93 = arith.constant 0.0293240696 : f32
      %230 = vector.broadcast %cst_93 : f32 to vector<2x128xf32>
      %231 = arith.addf %229, %230 : vector<2x128xf32>
      %cst_94 = arith.constant -1.72492277E-4 : f32
      %232 = vector.broadcast %cst_94 : f32 to vector<2x128xf32>
      %233 = arith.mulf %232, %217 : vector<2x128xf32>
      %cst_95 = arith.constant -2.08290505 : f32
      %234 = vector.broadcast %cst_95 : f32 to vector<2x128xf32>
      %235 = arith.addf %233, %234 : vector<2x128xf32>
      %236 = arith.mulf %235, %217 : vector<2x128xf32>
      %cst_96 = arith.constant 1.34753656 : f32
      %237 = vector.broadcast %cst_96 : f32 to vector<2x128xf32>
      %238 = arith.addf %236, %237 : vector<2x128xf32>
      %239 = arith.mulf %238, %217 : vector<2x128xf32>
      %cst_97 = arith.constant -0.669838607 : f32
      %240 = vector.broadcast %cst_97 : f32 to vector<2x128xf32>
      %241 = arith.addf %239, %240 : vector<2x128xf32>
      %242 = arith.divf %231, %241 : vector<2x128xf32>
      %cst_98 = arith.constant 5.000000e-01 : f32
      %243 = vector.broadcast %cst_98 : f32 to vector<2x128xf32>
      %244 = arith.mulf %243, %217 : vector<2x128xf32>
      %245 = arith.addf %242, %244 : vector<2x128xf32>
      %246 = arith.subf %242, %244 : vector<2x128xf32>
      %c127_i32_99 = arith.constant 127 : i32
      %247 = tpu.dynamic_rotate %246 by %c127_i32_99 dim 1 : vector<2x128xf32>, i32 -> vector<2x128xf32>
      %248 = arith.addf %245, %247 : vector<2x128xf32>
      %cst_100 = arith.constant 5.000000e-01 : f32
      %249 = vector.broadcast %cst_100 : f32 to vector<2x128xf32>
      %250 = arith.mulf %249, %248 : vector<2x128xf32>
      %c1_i32_101 = arith.constant 1 : i32
      %251 = tpu.dynamic_rotate %250 by %c1_i32_101 dim 1 : vector<2x128xf32>, i32 -> vector<2x128xf32>
      %252 = arith.subf %250, %251 : vector<2x128xf32>
      %cst_102 = arith.constant 4.000000e-02 : f32
      %253 = vector.broadcast %cst_102 : f32 to vector<2x128xf32>
      %254 = arith.mulf %253, %252 : vector<2x128xf32>
      %255 = arith.subf %217, %254 : vector<2x128xf32>
      %c127_i32_103 = arith.constant 127 : i32
      %256 = tpu.dynamic_rotate %255 by %c127_i32_103 dim 1 : vector<2x128xf32>, i32 -> vector<2x128xf32>
      %c1_i32_104 = arith.constant 1 : i32
      %257 = tpu.dynamic_rotate %255 by %c1_i32_104 dim 1 : vector<2x128xf32>, i32 -> vector<2x128xf32>
      %258 = arith.select %4, %257, %255 : vector<2x128xi1>, vector<2x128xf32>
      %259 = arith.select %2, %256, %258 : vector<2x128xi1>, vector<2x128xf32>
      %260 = arith.index_cast %c5_i32 : i32 to index
      %c0_105 = arith.constant 0 : index
      %c0_106 = arith.constant 0 : index
      %261 = vector.load %arg2[%260, %c0_105, %c0_106] : memref<8x2x128xf32, #tpu.memory_space<vmem>>, vector<1x2x128xf32>
      %262 = vector.shape_cast %261 : vector<1x2x128xf32> to vector<2x128xf32>
      %263 = vector.shape_cast %259 : vector<2x128xf32> to vector<1x2x128xf32>
      tpu.vector_store %arg2[%260, %c0_105, %c0_106], %263 {strides = array<i32>} : memref<8x2x128xf32, #tpu.memory_space<vmem>>, vector<1x2x128xf32>,
      %c6_i32 = arith.constant 6 : i32
      %cst_107 = arith.constant 1.66186851E-6 : f32
      %264 = vector.broadcast %cst_107 : f32 to vector<2x128xf32>
      %265 = arith.mulf %264, %259 : vector<2x128xf32>
      %cst_108 = arith.constant 0.0200628825 : f32
      %266 = vector.broadcast %cst_108 : f32 to vector<2x128xf32>
      %267 = arith.addf %265, %266 : vector<2x128xf32>
      %268 = arith.mulf %267, %259 : vector<2x128xf32>
      %cst_109 = arith.constant -0.0582602657 : f32
      %269 = vector.broadcast %cst_109 : f32 to vector<2x128xf32>
      %270 = arith.addf %268, %269 : vector<2x128xf32>
      %271 = arith.mulf %270, %259 : vector<2x128xf32>
      %cst_110 = arith.constant 0.0293240696 : f32
      %272 = vector.broadcast %cst_110 : f32 to vector<2x128xf32>
      %273 = arith.addf %271, %272 : vector<2x128xf32>
      %cst_111 = arith.constant -1.72492277E-4 : f32
      %274 = vector.broadcast %cst_111 : f32 to vector<2x128xf32>
      %275 = arith.mulf %274, %259 : vector<2x128xf32>
      %cst_112 = arith.constant -2.08290505 : f32
      %276 = vector.broadcast %cst_112 : f32 to vector<2x128xf32>
      %277 = arith.addf %275, %276 : vector<2x128xf32>
      %278 = arith.mulf %277, %259 : vector<2x128xf32>
      %cst_113 = arith.constant 1.34753656 : f32
      %279 = vector.broadcast %cst_113 : f32 to vector<2x128xf32>
      %280 = arith.addf %278, %279 : vector<2x128xf32>
      %281 = arith.mulf %280, %259 : vector<2x128xf32>
      %cst_114 = arith.constant -0.669838607 : f32
      %282 = vector.broadcast %cst_114 : f32 to vector<2x128xf32>
      %283 = arith.addf %281, %282 : vector<2x128xf32>
      %284 = arith.divf %273, %283 : vector<2x128xf32>
      %cst_115 = arith.constant 5.000000e-01 : f32
      %285 = vector.broadcast %cst_115 : f32 to vector<2x128xf32>
      %286 = arith.mulf %285, %259 : vector<2x128xf32>
      %287 = arith.addf %284, %286 : vector<2x128xf32>
      %288 = arith.subf %284, %286 : vector<2x128xf32>
      %c127_i32_116 = arith.constant 127 : i32
      %289 = tpu.dynamic_rotate %288 by %c127_i32_116 dim 1 : vector<2x128xf32>, i32 -> vector<2x128xf32>
      %290 = arith.addf %287, %289 : vector<2x128xf32>
      %cst_117 = arith.constant 5.000000e-01 : f32
      %291 = vector.broadcast %cst_117 : f32 to vector<2x128xf32>
      %292 = arith.mulf %291, %290 : vector<2x128xf32>
      %c1_i32_118 = arith.constant 1 : i32
      %293 = tpu.dynamic_rotate %292 by %c1_i32_118 dim 1 : vector<2x128xf32>, i32 -> vector<2x128xf32>
      %294 = arith.subf %292, %293 : vector<2x128xf32>
      %cst_119 = arith.constant 4.000000e-02 : f32
      %295 = vector.broadcast %cst_119 : f32 to vector<2x128xf32>
      %296 = arith.mulf %295, %294 : vector<2x128xf32>
      %297 = arith.subf %259, %296 : vector<2x128xf32>
      %c127_i32_120 = arith.constant 127 : i32
      %298 = tpu.dynamic_rotate %297 by %c127_i32_120 dim 1 : vector<2x128xf32>, i32 -> vector<2x128xf32>
      %c1_i32_121 = arith.constant 1 : i32
      %299 = tpu.dynamic_rotate %297 by %c1_i32_121 dim 1 : vector<2x128xf32>, i32 -> vector<2x128xf32>
      %300 = arith.select %4, %299, %297 : vector<2x128xi1>, vector<2x128xf32>
      %301 = arith.select %2, %298, %300 : vector<2x128xi1>, vector<2x128xf32>
      %302 = arith.index_cast %c6_i32 : i32 to index
      %c0_122 = arith.constant 0 : index
      %c0_123 = arith.constant 0 : index
      %303 = vector.load %arg2[%302, %c0_122, %c0_123] : memref<8x2x128xf32, #tpu.memory_space<vmem>>, vector<1x2x128xf32>
      %304 = vector.shape_cast %303 : vector<1x2x128xf32> to vector<2x128xf32>
      %305 = vector.shape_cast %301 : vector<2x128xf32> to vector<1x2x128xf32>
      tpu.vector_store %arg2[%302, %c0_122, %c0_123], %305 {strides = array<i32>} : memref<8x2x128xf32, #tpu.memory_space<vmem>>, vector<1x2x128xf32>,
      %c7_i32 = arith.constant 7 : i32
      %cst_124 = arith.constant 1.66186851E-6 : f32
      %306 = vector.broadcast %cst_124 : f32 to vector<2x128xf32>
      %307 = arith.mulf %306, %301 : vector<2x128xf32>
      %cst_125 = arith.constant 0.0200628825 : f32
      %308 = vector.broadcast %cst_125 : f32 to vector<2x128xf32>
      %309 = arith.addf %307, %308 : vector<2x128xf32>
      %310 = arith.mulf %309, %301 : vector<2x128xf32>
      %cst_126 = arith.constant -0.0582602657 : f32
      %311 = vector.broadcast %cst_126 : f32 to vector<2x128xf32>
      %312 = arith.addf %310, %311 : vector<2x128xf32>
      %313 = arith.mulf %312, %301 : vector<2x128xf32>
      %cst_127 = arith.constant 0.0293240696 : f32
      %314 = vector.broadcast %cst_127 : f32 to vector<2x128xf32>
      %315 = arith.addf %313, %314 : vector<2x128xf32>
      %cst_128 = arith.constant -1.72492277E-4 : f32
      %316 = vector.broadcast %cst_128 : f32 to vector<2x128xf32>
      %317 = arith.mulf %316, %301 : vector<2x128xf32>
      %cst_129 = arith.constant -2.08290505 : f32
      %318 = vector.broadcast %cst_129 : f32 to vector<2x128xf32>
      %319 = arith.addf %317, %318 : vector<2x128xf32>
      %320 = arith.mulf %319, %301 : vector<2x128xf32>
      %cst_130 = arith.constant 1.34753656 : f32
      %321 = vector.broadcast %cst_130 : f32 to vector<2x128xf32>
      %322 = arith.addf %320, %321 : vector<2x128xf32>
      %323 = arith.mulf %322, %301 : vector<2x128xf32>
      %cst_131 = arith.constant -0.669838607 : f32
      %324 = vector.broadcast %cst_131 : f32 to vector<2x128xf32>
      %325 = arith.addf %323, %324 : vector<2x128xf32>
      %326 = arith.divf %315, %325 : vector<2x128xf32>
      %cst_132 = arith.constant 5.000000e-01 : f32
      %327 = vector.broadcast %cst_132 : f32 to vector<2x128xf32>
      %328 = arith.mulf %327, %301 : vector<2x128xf32>
      %329 = arith.addf %326, %328 : vector<2x128xf32>
      %330 = arith.subf %326, %328 : vector<2x128xf32>
      %c127_i32_133 = arith.constant 127 : i32
      %331 = tpu.dynamic_rotate %330 by %c127_i32_133 dim 1 : vector<2x128xf32>, i32 -> vector<2x128xf32>
      %332 = arith.addf %329, %331 : vector<2x128xf32>
      %cst_134 = arith.constant 5.000000e-01 : f32
      %333 = vector.broadcast %cst_134 : f32 to vector<2x128xf32>
      %334 = arith.mulf %333, %332 : vector<2x128xf32>
      %c1_i32_135 = arith.constant 1 : i32
      %335 = tpu.dynamic_rotate %334 by %c1_i32_135 dim 1 : vector<2x128xf32>, i32 -> vector<2x128xf32>
      %336 = arith.subf %334, %335 : vector<2x128xf32>
      %cst_136 = arith.constant 4.000000e-02 : f32
      %337 = vector.broadcast %cst_136 : f32 to vector<2x128xf32>
      %338 = arith.mulf %337, %336 : vector<2x128xf32>
      %339 = arith.subf %301, %338 : vector<2x128xf32>
      %c127_i32_137 = arith.constant 127 : i32
      %340 = tpu.dynamic_rotate %339 by %c127_i32_137 dim 1 : vector<2x128xf32>, i32 -> vector<2x128xf32>
      %c1_i32_138 = arith.constant 1 : i32
      %341 = tpu.dynamic_rotate %339 by %c1_i32_138 dim 1 : vector<2x128xf32>, i32 -> vector<2x128xf32>
      %342 = arith.select %4, %341, %339 : vector<2x128xi1>, vector<2x128xf32>
      %343 = arith.select %2, %340, %342 : vector<2x128xi1>, vector<2x128xf32>
      %344 = arith.index_cast %c7_i32 : i32 to index
      %c0_139 = arith.constant 0 : index
      %c0_140 = arith.constant 0 : index
      %345 = vector.load %arg2[%344, %c0_139, %c0_140] : memref<8x2x128xf32, #tpu.memory_space<vmem>>, vector<1x2x128xf32>
      %346 = vector.shape_cast %345 : vector<1x2x128xf32> to vector<2x128xf32>
      %347 = vector.shape_cast %343 : vector<2x128xf32> to vector<1x2x128xf32>
      tpu.vector_store %arg2[%344, %c0_139, %c0_140], %347 {strides = array<i32>} : memref<8x2x128xf32, #tpu.memory_space<vmem>>, vector<1x2x128xf32>,
      %c8_i32 = arith.constant 8 : i32
      %c0_141 = arith.constant 0 : index
      %c0_142 = arith.constant 0 : index
      %348 = vector.load %arg3[%c0_141, %c0_142] : memref<2x128xf32, #tpu.memory_space<vmem>>, vector<2x128xf32>
      tpu.vector_store %arg3[%c0_141, %c0_142], %343 {strides = array<i32>} : memref<2x128xf32, #tpu.memory_space<vmem>>, vector<2x128xf32>,
    } else {
    }
    return
  }
  func.func @transform_0(%arg0: i32) -> (i32, i32) {
    %c0_i32 = arith.constant 0 : i32
    %c0_i32_0 = arith.constant 0 : i32
    %c0_i32_1 = arith.constant 0 : i32
    return %c0_i32, %c0_i32_0 : i32, i32
  }
  func.func @transform_1(%arg0: i32) -> (i32, i32, i32) {
    %c0_i32 = arith.constant 0 : i32
    %c0_i32_0 = arith.constant 0 : i32
    %c0_i32_1 = arith.constant 0 : i32
    return %arg0, %c0_i32, %c0_i32_0 : i32, i32, i32
  }
}

</mosaic_0001>

<bundles_post_ra>
// kernel: tpu_custom_call.1
= control target key start
LH: loop header
LB: loop body
LE: loop exit
PB: predicated region body
PF: predicated region fallthrough
CT: control target
= control target key end

     0   :  { %6 = vsyncpa [#allocation4], 0  ;;  %s1201_s0 = inlined_call_operand.hbm [shape: f32[2,128], index: 0, kind: input, shape index: {}]   ;;  %s1202_s1 = inlined_call_operand.hbm [shape: f32[64,2,128], index: 1, kind: output, shape index: {}]  }
   0x1   :  { %7 = vsyncpa [#allocation5], 0 }
   0x2   :  { %9 = vsyncpa [#allocation5 + $0x1], 0  ;;  %s935_s6 = smov 0   ;;  %s937_s7 = smov 0  }
   0x3   :  { %s939_s8 = smov 0   ;;  %s941_s9 = smov 0  }
   0x4 LB: > { %s956_s10 = sadd.s32 4294967295, %s915_s9   ;;  %s711_s11 = sadd.s32 4294967294, %s915_s9   ;;  %s915_s9 = sphi %s941_s9, %s1211_s9   ;;  %s911_s8 = sphi %s939_s8, %s1210_s8   ;;  %s907_s7 = sphi %s937_s7, %s1209_s7   ;;  %s903_s6 = sphi %s935_s6, %s1208_s6  }
   0x5   : > { %s960_s12 = sadd.s32 1, %s915_s9   ;;  %s43_s13 = sadd.s32 1, %s911_s8 }
   0x6   : > { %s40_s14 = ssub.s32 %s915_s9, %s960_s12  ;;  %p53_p0 = scmp.ne.s32.totalorder %s911_s8, %s907_s7 }
   0x7   : > { %p41_p1 = scmp.eq.s32.totalorder %s40_s14, 0  ;;  %p54_p2 = scmp.eq.s32.totalorder %s956_s10, 7 }
   0x8   : > { %p59_p3 = scmp.ne.s32.totalorder %s907_s7, %s903_s6  ;;  %p60_p4 = scmp.eq.s32.totalorder %s711_s11, 7 }
   0x9   : > { %s971_s15 = scalar_select %p41_p1, %s911_s8, %s43_s13  }
   0xa   : > { %p973_p5 = por %p54_p2, %p53_p0  ;;  %p977_p6 = por %p60_p4, %p59_p3 }
   0xb   : > { %p712_p7 = scmp.ge.s32.totalorder %s915_s9, 1  ;;  %p67_p8 = scmp.lt.s32.totalorder %s915_s9, 9 }
   0xc   : > { %s1204_s17 = scalar_select %p977_p6, 1, 0 }
   0xd   : > { %p753_p10 = scmp.eq.s32.totalorder %s956_s10, 0  ;;  %p985_p11 = pnand %p712_p7, %p67_p8 }
   0xe   : > { %s917_s19 = smov [#allocation3]  }
   0xf   : > { %s80_s20 = sshll.u32 %s917_s19, 4  ;;  %p745_p12 = pneg %p985_p11  ;;  %s81_s20 = int_to_ptr.vmem [resolvable:$true] %s80_s20 }
  0x10   : > { %s836_s21 = scalar_lea.vmem %s81_s20, 32  ;;  %p844_p4 = scmp.lt.s32.totalorder %s81_s20, %s81_s20 }
  0x11   : > { %p746_p13 = pnand %p753_p10, %p745_p12  ;;  %p837_p1 = scmp.ne.s32.totalorder %s81_s20, %s836_s21 }
  0x12   : > { %p845_p9 = scmp.lt.s32.totalorder %s836_s21, %s836_s21 }
  0x13   : > { %p827_p0 = pneg %p746_p13 }
  0x14   : > { %p846_p6 = por %p845_p9, %p844_p4 }
  0x15   : > { %p839_p2 = pnand %p837_p1, %p827_p0 }
  0x17   : > { %p840_p3 = pneg %p839_p2 }
  0x19   : > { %p847_p7 = pnand %p846_p6, %p840_p3 }
  0x1b   : > { %850 = shalt.err (!%p847_p7)
}
  0x1c   : > { %748 = dma.hbm_to_vmem [thread:$0]  (!%p746_p13), %s1201_s0, 32, %s81_s20, [#allocation4]  }
  0x1d   : > { %93 = sbr.rel (%p985_p11) target bundleno = 5888 (0x1700), region = 24 }
  0x22   : > { %894 = dma.done.wait (%p753_p10), [#allocation4], 32  }
  0x23   : > { %896 = vsyncadd (%p753_p10), [#allocation4], 4294967264  ;;  %s105_s24 = sand.u32 1, %s907_s7   ;;  %v109_v0 = vlaneseq  ;;  %p1206_p6 = scmp.ne.s32.totalorder %s956_s10, 0 }
  0x24   : > { %s716_s25 = sshll.u32 %s105_s24, 4  ;;  %s918_s27 = smov (!%p1206_p6), 127  }
  0x25   : > { %v1005_v1 = vand.u32 127, %v109_v0  ;;  %s1009_s26 = scalar_lea.vmem [#allocation6], %s716_s25  ;;  %116 = sbr.rel (%p1206_p6) target bundleno = 2756 (0xac4), region = 32 }
  0x26   : > { %s919_s28 = smov (!%p1206_p6), 1  }
  0x27   : > { %vm111_vm0 = vcmp.eq.s32.totalorder %v1005_v1, 0  ;;  %vm112_vm1 = vcmp.eq.s32.totalorder %v1005_v1, 127 }
  0x2a   : > { %v117_v2 = vld [vmem:[#allocation3] sm:$0x3] }
  0x2b   : > { %v125_v3 = vmul.f32 -0.00017249228, %v117_v2  ;;  %118 = vst [vmem:[%s1009_s26] sm:$0x3] %v117_v2  ;;  %v119_v4 = vmul.f32 1.6618685e-06, %v117_v2  ;;  %v133_v15 = vmul.f32 0.5, %v117_v2 }
  0x2d   : > { %v126_v5 = vadd.f32 -2.082905, %v125_v3  ;;  %v120_v7 = vadd.f32 0.020062882, %v119_v4 }
  0x2f   : > { %v127_v6 = vmul.f32 %v126_v5, %v117_v2  ;;  %v121_v10 = vmul.f32 %v120_v7, %v117_v2 }
  0x31   : > { %v128_v8 = vadd.f32 1.3475366, %v127_v6  ;;  %v122_v12 = vadd.f32 -0.058260266, %v121_v10 }
  0x33   : > { %v129_v9 = vmul.f32 %v128_v8, %v117_v2  ;;  %v123_v13 = vmul.f32 %v122_v12, %v117_v2 }
  0x35   : > { %v130_v11 = vadd.f32 -0.6698386, %v129_v9  ;;  %v124_v14 = vadd.f32 0.02932407, %v123_v13 }
  0x37   : > { %795 = vrcp.f32 %v130_v11 }
  0x44   : > { %v796_v16 = vpop.eup %795 }
  0x45   : > { %v132_v17 = vmul.f32 %v796_v16, %v124_v14 }
  0x47   : > { %v135_v18 = vsub.f32 %v132_v17, %v133_v15  ;;  %v134_v19 = vadd.f32 %v133_v15, %v132_v17 }
  0x49   : > { %136 = vrot.lane.b32.xlu0 %v135_v18, %s918_s27 }
  0xbb   : > { %v137_v20 = vpop.permute.xlu0 %136 }
  0xbc   : > { %v138_v21 = vadd.f32 %v137_v20, %v134_v19 }
  0xbe   : > { %v139_v22 = vmul.f32 0.5, %v138_v21 }
  0xc0   : > { %140 = vrot.lane.b32.xlu0 %v139_v22, %s919_s28 }
 0x132   : > { %v141_v23 = vpop.permute.xlu0 %140 }
 0x133   : > { %v142_v24 = vsub.f32 %v139_v22, %v141_v23 }
 0x135   : > { %v143_v25 = vmul.f32 0.04, %v142_v24 }
 0x137   : > { %v144_v26 = vsub.f32 %v117_v2, %v143_v25 }
 0x139   : > { %147 = vrot.lane.b32.xlu1 %v144_v26, %s919_s28 }
 0x13d   : > { %145 = vrot.lane.b32.xlu1 %v144_v26, %s918_s27 }
 0x1ab   : > { %v148_v27 = vpop.permute.xlu1 %147 }
 0x1ac   : > { %v149_v28 = vsel %vm112_vm1, %v148_v27, %v144_v26 }
 0x1af   : > { %v146_v29 = vpop.permute.xlu1 %145 }
 0x1b0   : > { %v150_v30 = vsel %vm111_vm0, %v146_v29, %v149_v28 }
 0x1b1   : > { %718 = vst [vmem:[%s1009_s26 + $0x2] sm:$0x3] %v150_v30  ;;  %v159_v31 = vmul.f32 -0.00017249228, %v150_v30  ;;  %v153_v34 = vmul.f32 1.6618685e-06, %v150_v30 }
 0x1b2   : > { %v167_v45 = vmul.f32 0.5, %v150_v30 }
 0x1b3   : > { %v160_v32 = vadd.f32 -2.082905, %v159_v31  ;;  %v154_v37 = vadd.f32 0.020062882, %v153_v34 }
 0x1b5   : > { %v161_v33 = vmul.f32 %v160_v32, %v150_v30  ;;  %v155_v39 = vmul.f32 %v154_v37, %v150_v30 }
 0x1b7   : > { %v162_v35 = vadd.f32 1.3475366, %v161_v33  ;;  %v156_v40 = vadd.f32 -0.058260266, %v155_v39 }
 0x1b9   : > { %v163_v36 = vmul.f32 %v162_v35, %v150_v30  ;;  %v157_v41 = vmul.f32 %v156_v40, %v150_v30 }
 0x1bb   : > { %v164_v38 = vadd.f32 -0.6698386, %v163_v36  ;;  %v158_v42 = vadd.f32 0.02932407, %v157_v41 }
 0x1bd   : > { %797 = vrcp.f32 %v164_v38 }
 0x1ca   : > { %v798_v43 = vpop.eup %797 }
 0x1cb   : > { %v166_v44 = vmul.f32 %v798_v43, %v158_v42 }
 0x1cd   : > { %v169_v46 = vsub.f32 %v166_v44, %v167_v45  ;;  %v168_v47 = vadd.f32 %v167_v45, %v166_v44 }
 0x1cf   : > { %170 = vrot.lane.b32.xlu0 %v169_v46, %s918_s27 }
 0x241   : > { %v171_v48 = vpop.permute.xlu0 %170 }
 0x242   : > { %v172_v49 = vadd.f32 %v171_v48, %v168_v47 }
 0x244   : > { %v173_v50 = vmul.f32 0.5, %v172_v49 }
 0x246   : > { %174 = vrot.lane.b32.xlu1 %v173_v50, %s919_s28 }
 0x2b8   : > { %v175_v51 = vpop.permute.xlu1 %174 }
 0x2b9   : > { %v176_v52 = vsub.f32 %v173_v50, %v175_v51 }
 0x2bb   : > { %v177_v53 = vmul.f32 0.04, %v176_v52 }
 0x2bd   : > { %v178_v54 = vsub.f32 %v150_v30, %v177_v53 }
 0x2bf   : > { %179 = vrot.lane.b32.xlu1 %v178_v54, %s918_s27  ;;  %181 = vrot.lane.b32.xlu0 %v178_v54, %s919_s28 }
 0x331   : > { %v180_v55 = vpop.permute.xlu1 %179  ;;  %v182_v56 = vpop.permute.xlu0 %181 }
 0x332   : > { %v183_v57 = vsel %vm112_vm1, %v182_v56, %v178_v54 }
 0x333   : > { %v184_v58 = vsel %vm111_vm0, %v180_v55, %v183_v57 }
 0x334   : > { %719 = vst [vmem:[%s1009_s26 + $0x4] sm:$0x3] %v184_v58  ;;  %v193_v59 = vmul.f32 -0.00017249228, %v184_v58  ;;  %v187_v62 = vmul.f32 1.6618685e-06, %v184_v58 }
 0x335   : > { %v201_v10 = vmul.f32 0.5, %v184_v58 }
 0x336   : > { %v194_v60 = vadd.f32 -2.082905, %v193_v59  ;;  %v188_v0 = vadd.f32 0.020062882, %v187_v62 }
 0x338   : > { %v195_v61 = vmul.f32 %v194_v60, %v184_v58  ;;  %v189_v4 = vmul.f32 %v188_v0, %v184_v58 }
 0x33a   : > { %v196_v63 = vadd.f32 1.3475366, %v195_v61  ;;  %v190_v5 = vadd.f32 -0.058260266, %v189_v4 }
 0x33c   : > { %v197_v2 = vmul.f32 %v196_v63, %v184_v58  ;;  %v191_v6 = vmul.f32 %v190_v5, %v184_v58 }
 0x33e   : > { %v198_v3 = vadd.f32 -0.6698386, %v197_v2  ;;  %v192_v7 = vadd.f32 0.02932407, %v191_v6 }
 0x340   : > { %799 = vrcp.f32 %v198_v3 }
 0x34d   : > { %v800_v8 = vpop.eup %799 }
 0x34e   : > { %v200_v9 = vmul.f32 %v800_v8, %v192_v7 }
 0x350   : > { %v203_v11 = vsub.f32 %v200_v9, %v201_v10  ;;  %v202_v12 = vadd.f32 %v201_v10, %v200_v9 }
 0x352   : > { %204 = vrot.lane.b32.xlu0 %v203_v11, %s918_s27 }
 0x3c4   : > { %v205_v13 = vpop.permute.xlu0 %204 }
 0x3c5   : > { %v206_v14 = vadd.f32 %v205_v13, %v202_v12 }
 0x3c7   : > { %v207_v15 = vmul.f32 0.5, %v206_v14 }
 0x3c9   : > { %208 = vrot.lane.b32.xlu1 %v207_v15, %s919_s28 }
 0x43b   : > { %v209_v16 = vpop.permute.xlu1 %208 }
 0x43c   : > { %v210_v17 = vsub.f32 %v207_v15, %v209_v16 }
 0x43e   : > { %v211_v18 = vmul.f32 0.04, %v210_v17 }
 0x440   : > { %v212_v19 = vsub.f32 %v184_v58, %v211_v18 }
 0x442   : > { %213 = vrot.lane.b32.xlu1 %v212_v19, %s918_s27  ;;  %215 = vrot.lane.b32.xlu0 %v212_v19, %s919_s28 }
 0x4b4   : > { %v214_v20 = vpop.permute.xlu1 %213  ;;  %v216_v21 = vpop.permute.xlu0 %215 }
 0x4b5   : > { %v217_v22 = vsel %vm112_vm1, %v216_v21, %v212_v19 }
 0x4b6   : > { %v218_v23 = vsel %vm111_vm0, %v214_v20, %v217_v22 }
 0x4b7   : > { %720 = vst [vmem:[%s1009_s26 + $0x6] sm:$0x3] %v218_v23  ;;  %v227_v24 = vmul.f32 -0.00017249228, %v218_v23  ;;  %v221_v27 = vmul.f32 1.6618685e-06, %v218_v23 }
 0x4b8   : > { %v235_v38 = vmul.f32 0.5, %v218_v23 }
 0x4b9   : > { %v228_v25 = vadd.f32 -2.082905, %v227_v24  ;;  %v222_v29 = vadd.f32 0.020062882, %v221_v27 }
 0x4bb   : > { %v229_v26 = vmul.f32 %v228_v25, %v218_v23  ;;  %v223_v32 = vmul.f32 %v222_v29, %v218_v23 }
 0x4bd   : > { %v230_v28 = vadd.f32 1.3475366, %v229_v26  ;;  %v224_v33 = vadd.f32 -0.058260266, %v223_v32 }
 0x4bf   : > { %v231_v30 = vmul.f32 %v230_v28, %v218_v23  ;;  %v225_v34 = vmul.f32 %v224_v33, %v218_v23 }
 0x4c1   : > { %v232_v31 = vadd.f32 -0.6698386, %v231_v30  ;;  %v226_v35 = vadd.f32 0.02932407, %v225_v34 }
 0x4c3   : > { %801 = vrcp.f32 %v232_v31 }
 0x4d0   : > { %v802_v36 = vpop.eup %801 }
 0x4d1   : > { %v234_v37 = vmul.f32 %v802_v36, %v226_v35 }
 0x4d3   : > { %v237_v39 = vsub.f32 %v234_v37, %v235_v38  ;;  %v236_v40 = vadd.f32 %v235_v38, %v234_v37 }
 0x4d5   : > { %238 = vrot.lane.b32.xlu0 %v237_v39, %s918_s27 }
 0x547   : > { %v239_v41 = vpop.permute.xlu0 %238 }
 0x548   : > { %v240_v42 = vadd.f32 %v239_v41, %v236_v40 }
 0x54a   : > { %v241_v43 = vmul.f32 0.5, %v240_v42 }
 0x54c   : > { %242 = vrot.lane.b32.xlu1 %v241_v43, %s919_s28 }
 0x5be   : > { %v243_v44 = vpop.permute.xlu1 %242 }
 0x5bf   : > { %v244_v45 = vsub.f32 %v241_v43, %v243_v44 }
 0x5c1   : > { %v245_v46 = vmul.f32 0.04, %v244_v45 }
 0x5c3   : > { %v246_v47 = vsub.f32 %v218_v23, %v245_v46 }
 0x5c5   : > { %247 = vrot.lane.b32.xlu1 %v246_v47, %s918_s27  ;;  %249 = vrot.lane.b32.xlu0 %v246_v47, %s919_s28 }
 0x637   : > { %v248_v48 = vpop.permute.xlu1 %247  ;;  %v250_v49 = vpop.permute.xlu0 %249 }
 0x638   : > { %v251_v50 = vsel %vm112_vm1, %v250_v49, %v246_v47 }
 0x639   : > { %v252_v51 = vsel %vm111_vm0, %v248_v48, %v251_v50 }
 0x63a   : > { %721 = vst [vmem:[%s1009_s26 + $0x8] sm:$0x3] %v252_v51  ;;  %v261_v52 = vmul.f32 -0.00017249228, %v252_v51  ;;  %v255_v55 = vmul.f32 1.6618685e-06, %v252_v51 }
 0x63b   : > { %v269_v3 = vmul.f32 0.5, %v252_v51 }
 0x63c   : > { %v262_v53 = vadd.f32 -2.082905, %v261_v52  ;;  %v256_v57 = vadd.f32 0.020062882, %v255_v55 }
 0x63e   : > { %v263_v54 = vmul.f32 %v262_v53, %v252_v51  ;;  %v257_v60 = vmul.f32 %v256_v57, %v252_v51 }
 0x640   : > { %v264_v56 = vadd.f32 1.3475366, %v263_v54  ;;  %v258_v61 = vadd.f32 -0.058260266, %v257_v60 }
 0x642   : > { %v265_v58 = vmul.f32 %v264_v56, %v252_v51  ;;  %v259_v62 = vmul.f32 %v258_v61, %v252_v51 }
 0x644   : > { %v266_v59 = vadd.f32 -0.6698386, %v265_v58  ;;  %v260_v63 = vadd.f32 0.02932407, %v259_v62 }
 0x646   : > { %803 = vrcp.f32 %v266_v59 }
 0x653   : > { %v804_v0 = vpop.eup %803 }
 0x654   : > { %v268_v2 = vmul.f32 %v804_v0, %v260_v63 }
 0x656   : > { %v271_v4 = vsub.f32 %v268_v2, %v269_v3  ;;  %v270_v5 = vadd.f32 %v269_v3, %v268_v2 }
 0x658   : > { %272 = vrot.lane.b32.xlu0 %v271_v4, %s918_s27 }
 0x6ca   : > { %v273_v6 = vpop.permute.xlu0 %272 }
 0x6cb   : > { %v274_v7 = vadd.f32 %v273_v6, %v270_v5 }
 0x6cd   : > { %v275_v8 = vmul.f32 0.5, %v274_v7 }
 0x6cf   : > { %276 = vrot.lane.b32.xlu1 %v275_v8, %s919_s28 }
 0x741   : > { %v277_v9 = vpop.permute.xlu1 %276 }
 0x742   : > { %v278_v10 = vsub.f32 %v275_v8, %v277_v9 }
 0x744   : > { %v279_v11 = vmul.f32 0.04, %v278_v10 }
 0x746   : > { %v280_v12 = vsub.f32 %v252_v51, %v279_v11 }
 0x748   : > { %281 = vrot.lane.b32.xlu1 %v280_v12, %s918_s27  ;;  %283 = vrot.lane.b32.xlu0 %v280_v12, %s919_s28 }
 0x7ba   : > { %v282_v13 = vpop.permute.xlu1 %281  ;;  %v284_v14 = vpop.permute.xlu0 %283 }
 0x7bb   : > { %v285_v15 = vsel %vm112_vm1, %v284_v14, %v280_v12 }
 0x7bc   : > { %v286_v16 = vsel %vm111_vm0, %v282_v13, %v285_v15 }
 0x7bd   : > { %722 = vst [vmem:[%s1009_s26 + $0xa] sm:$0x3] %v286_v16  ;;  %v295_v17 = vmul.f32 -0.00017249228, %v286_v16  ;;  %v289_v20 = vmul.f32 1.6618685e-06, %v286_v16 }
 0x7be   : > { %v303_v31 = vmul.f32 0.5, %v286_v16 }
 0x7bf   : > { %v296_v18 = vadd.f32 -2.082905, %v295_v17  ;;  %v290_v22 = vadd.f32 0.020062882, %v289_v20 }
 0x7c1   : > { %v297_v19 = vmul.f32 %v296_v18, %v286_v16  ;;  %v291_v25 = vmul.f32 %v290_v22, %v286_v16 }
 0x7c3   : > { %v298_v21 = vadd.f32 1.3475366, %v297_v19  ;;  %v292_v26 = vadd.f32 -0.058260266, %v291_v25 }
 0x7c5   : > { %v299_v23 = vmul.f32 %v298_v21, %v286_v16  ;;  %v293_v27 = vmul.f32 %v292_v26, %v286_v16 }
 0x7c7   : > { %v300_v24 = vadd.f32 -0.6698386, %v299_v23  ;;  %v294_v28 = vadd.f32 0.02932407, %v293_v27 }
 0x7c9   : > { %805 = vrcp.f32 %v300_v24 }
 0x7d6   : > { %v806_v29 = vpop.eup %805 }
 0x7d7   : > { %v302_v30 = vmul.f32 %v806_v29, %v294_v28 }
 0x7d9   : > { %v305_v32 = vsub.f32 %v302_v30, %v303_v31  ;;  %v304_v33 = vadd.f32 %v303_v31, %v302_v30 }
 0x7db   : > { %306 = vrot.lane.b32.xlu0 %v305_v32, %s918_s27 }
 0x84d   : > { %v307_v34 = vpop.permute.xlu0 %306 }
 0x84e   : > { %v308_v35 = vadd.f32 %v307_v34, %v304_v33 }
 0x850   : > { %v309_v36 = vmul.f32 0.5, %v308_v35 }
 0x852   : > { %310 = vrot.lane.b32.xlu1 %v309_v36, %s919_s28 }
 0x8c4   : > { %v311_v37 = vpop.permute.xlu1 %310 }
 0x8c5   : > { %v312_v38 = vsub.f32 %v309_v36, %v311_v37 }
 0x8c7   : > { %v313_v39 = vmul.f32 0.04, %v312_v38 }
 0x8c9   : > { %v314_v40 = vsub.f32 %v286_v16, %v313_v39 }
 0x8cb   : > { %315 = vrot.lane.b32.xlu1 %v314_v40, %s918_s27  ;;  %317 = vrot.lane.b32.xlu0 %v314_v40, %s919_s28 }
 0x93d   : > { %v316_v41 = vpop.permute.xlu1 %315  ;;  %v318_v42 = vpop.permute.xlu0 %317 }
 0x93e   : > { %v319_v43 = vsel %vm112_vm1, %v318_v42, %v314_v40 }
 0x93f   : > { %v320_v44 = vsel %vm111_vm0, %v316_v41, %v319_v43 }
 0x940   : > { %723 = vst [vmem:[%s1009_s26 + $0xc] sm:$0x3] %v320_v44  ;;  %v329_v45 = vmul.f32 -0.00017249228, %v320_v44  ;;  %v323_v48 = vmul.f32 1.6618685e-06, %v320_v44 }
 0x941   : > { %v337_v59 = vmul.f32 0.5, %v320_v44 }
 0x942   : > { %v330_v46 = vadd.f32 -2.082905, %v329_v45  ;;  %v324_v50 = vadd.f32 0.020062882, %v323_v48 }
 0x944   : > { %v331_v47 = vmul.f32 %v330_v46, %v320_v44  ;;  %v325_v53 = vmul.f32 %v324_v50, %v320_v44 }
 0x946   : > { %v332_v49 = vadd.f32 1.3475366, %v331_v47  ;;  %v326_v54 = vadd.f32 -0.058260266, %v325_v53 }
 0x948   : > { %v333_v51 = vmul.f32 %v332_v49, %v320_v44  ;;  %v327_v55 = vmul.f32 %v326_v54, %v320_v44 }
 0x94a   : > { %v334_v52 = vadd.f32 -0.6698386, %v333_v51  ;;  %v328_v56 = vadd.f32 0.02932407, %v327_v55 }
 0x94c   : > { %807 = vrcp.f32 %v334_v52 }
 0x959   : > { %v808_v57 = vpop.eup %807 }
 0x95a   : > { %v336_v58 = vmul.f32 %v808_v57, %v328_v56 }
 0x95c   : > { %v339_v60 = vsub.f32 %v336_v58, %v337_v59  ;;  %v338_v61 = vadd.f32 %v337_v59, %v336_v58 }
 0x95e   : > { %340 = vrot.lane.b32.xlu0 %v339_v60, %s918_s27 }
 0x9d0   : > { %v341_v62 = vpop.permute.xlu0 %340 }
 0x9d1   : > { %v342_v63 = vadd.f32 %v341_v62, %v338_v61 }
 0x9d3   : > { %v343_v0 = vmul.f32 0.5, %v342_v63 }
 0x9d5   : > { %344 = vrot.lane.b32.xlu1 %v343_v0, %s919_s28 }
 0xa47   : > { %v345_v2 = vpop.permute.xlu1 %344 }
 0xa48   : > { %v346_v3 = vsub.f32 %v343_v0, %v345_v2 }
 0xa4a   : > { %v347_v4 = vmul.f32 0.04, %v346_v3 }
 0xa4c   : > { %v348_v5 = vsub.f32 %v320_v44, %v347_v4 }
 0xa4e   : > { %349 = vrot.lane.b32.xlu1 %v348_v5, %s918_s27  ;;  %351 = vrot.lane.b32.xlu0 %v348_v5, %s919_s28 }
 0xac0   : > { %v350_v6 = vpop.permute.xlu1 %349  ;;  %v352_v7 = vpop.permute.xlu0 %351 }
 0xac1   : > { %v353_v8 = vsel %vm112_vm1, %v352_v7, %v348_v5 }
 0xac2   : > { %v354_v9 = vsel %vm111_vm0, %v350_v6, %v353_v8 }
 0xac3   : > { %724 = vst [vmem:[%s1009_s26 + $0xe] sm:$0x3] %v354_v9  ;;  %357 = vst [vmem:[#allocation2] sm:$0x3] %v354_v9 }
 0xac4 PF: > { %p725_p8 = scmp.le.s32.totalorder %s956_s10, 0 }
 0xac5   : > { %s920_s29 = smov (!%p725_p8), 127   ;;  %s921_s30 = smov (!%p725_p8), 1  }
 0xac6   : > { %361 = sbr.rel (%p725_p8) target bundleno = 5864 (0x16e8), region = 36 }
 0xacb   : > { %v362_v10 = vld [vmem:[#allocation2] sm:$0x3] }
 0xacc   : > { %v369_v11 = vmul.f32 -0.00017249228, %v362_v10  ;;  %v363_v12 = vmul.f32 1.6618685e-06, %v362_v10  ;;  %v377_v23 = vmul.f32 0.5, %v362_v10 }
 0xace   : > { %v370_v13 = vadd.f32 -2.082905, %v369_v11  ;;  %v364_v15 = vadd.f32 0.020062882, %v363_v12 }
 0xad0   : > { %v371_v14 = vmul.f32 %v370_v13, %v362_v10  ;;  %v365_v18 = vmul.f32 %v364_v15, %v362_v10 }
 0xad2   : > { %v372_v16 = vadd.f32 1.3475366, %v371_v14  ;;  %v366_v20 = vadd.f32 -0.058260266, %v365_v18 }
 0xad4   : > { %v373_v17 = vmul.f32 %v372_v16, %v362_v10  ;;  %v367_v21 = vmul.f32 %v366_v20, %v362_v10 }
 0xad6   : > { %v374_v19 = vadd.f32 -0.6698386, %v373_v17  ;;  %v368_v22 = vadd.f32 0.02932407, %v367_v21 }
 0xad8   : > { %809 = vrcp.f32 %v374_v19 }
 0xae5   : > { %v810_v24 = vpop.eup %809 }
 0xae6   : > { %v376_v25 = vmul.f32 %v810_v24, %v368_v22 }
 0xae8   : > { %v379_v26 = vsub.f32 %v376_v25, %v377_v23  ;;  %v378_v27 = vadd.f32 %v377_v23, %v376_v25 }
 0xaea   : > { %380 = vrot.lane.b32.xlu0 %v379_v26, %s920_s29 }
 0xb5c   : > { %v381_v28 = vpop.permute.xlu0 %380 }
 0xb5d   : > { %v382_v29 = vadd.f32 %v381_v28, %v378_v27 }
 0xb5f   : > { %v383_v30 = vmul.f32 0.5, %v382_v29 }
 0xb61   : > { %384 = vrot.lane.b32.xlu0 %v383_v30, %s921_s30 }
 0xbd3   : > { %v385_v31 = vpop.permute.xlu0 %384 }
 0xbd4   : > { %v386_v32 = vsub.f32 %v383_v30, %v385_v31 }
 0xbd6   : > { %v387_v33 = vmul.f32 0.04, %v386_v32 }
 0xbd8   : > { %v388_v34 = vsub.f32 %v362_v10, %v387_v33 }
 0xbda   : > { %391 = vrot.lane.b32.xlu1 %v388_v34, %s921_s30 }
 0xbde   : > { %389 = vrot.lane.b32.xlu1 %v388_v34, %s920_s29 }
 0xc4c   : > { %v392_v35 = vpop.permute.xlu1 %391 }
 0xc4d   : > { %v393_v36 = vsel %vm112_vm1, %v392_v35, %v388_v34 }
 0xc50   : > { %v390_v37 = vpop.permute.xlu1 %389 }
 0xc51   : > { %v394_v38 = vsel %vm111_vm0, %v390_v37, %v393_v36 }
 0xc52   : > { %395 = vst [vmem:[%s1009_s26] sm:$0x3] %v394_v38  ;;  %v402_v39 = vmul.f32 -0.00017249228, %v394_v38  ;;  %v396_v42 = vmul.f32 1.6618685e-06, %v394_v38  ;;  %v410_v53 = vmul.f32 0.5, %v394_v38 }
 0xc54   : > { %v403_v40 = vadd.f32 -2.082905, %v402_v39  ;;  %v397_v45 = vadd.f32 0.020062882, %v396_v42 }
 0xc56   : > { %v404_v41 = vmul.f32 %v403_v40, %v394_v38  ;;  %v398_v47 = vmul.f32 %v397_v45, %v394_v38 }
 0xc58   : > { %v405_v43 = vadd.f32 1.3475366, %v404_v41  ;;  %v399_v48 = vadd.f32 -0.058260266, %v398_v47 }
 0xc5a   : > { %v406_v44 = vmul.f32 %v405_v43, %v394_v38  ;;  %v400_v49 = vmul.f32 %v399_v48, %v394_v38 }
 0xc5c   : > { %v407_v46 = vadd.f32 -0.6698386, %v406_v44  ;;  %v401_v50 = vadd.f32 0.02932407, %v400_v49 }
 0xc5e   : > { %811 = vrcp.f32 %v407_v46 }
 0xc6b   : > { %v812_v51 = vpop.eup %811 }
 0xc6c   : > { %v409_v52 = vmul.f32 %v812_v51, %v401_v50 }
 0xc6e   : > { %v412_v54 = vsub.f32 %v409_v52, %v410_v53  ;;  %v411_v55 = vadd.f32 %v410_v53, %v409_v52 }
 0xc70   : > { %413 = vrot.lane.b32.xlu0 %v412_v54, %s920_s29 }
 0xce2   : > { %v414_v56 = vpop.permute.xlu0 %413 }
 0xce3   : > { %v415_v57 = vadd.f32 %v414_v56, %v411_v55 }
 0xce5   : > { %v416_v58 = vmul.f32 0.5, %v415_v57 }
 0xce7   : > { %417 = vrot.lane.b32.xlu1 %v416_v58, %s921_s30 }
 0xd59   : > { %v418_v59 = vpop.permute.xlu1 %417 }
 0xd5a   : > { %v419_v60 = vsub.f32 %v416_v58, %v418_v59 }
 0xd5c   : > { %v420_v61 = vmul.f32 0.04, %v419_v60 }
 0xd5e   : > { %v421_v62 = vsub.f32 %v394_v38, %v420_v61 }
 0xd60   : > { %422 = vrot.lane.b32.xlu1 %v421_v62, %s920_s29  ;;  %424 = vrot.lane.b32.xlu0 %v421_v62, %s921_s30 }
 0xdd2   : > { %v423_v63 = vpop.permute.xlu1 %422  ;;  %v425_v0 = vpop.permute.xlu0 %424 }
 0xdd3   : > { %v426_v2 = vsel %vm112_vm1, %v425_v0, %v421_v62 }
 0xdd4   : > { %v427_v3 = vsel %vm111_vm0, %v423_v63, %v426_v2 }
 0xdd5   : > { %726 = vst [vmem:[%s1009_s26 + $0x2] sm:$0x3] %v427_v3  ;;  %v436_v4 = vmul.f32 -0.00017249228, %v427_v3  ;;  %v430_v7 = vmul.f32 1.6618685e-06, %v427_v3 }
 0xdd6   : > { %v444_v18 = vmul.f32 0.5, %v427_v3 }
 0xdd7   : > { %v437_v5 = vadd.f32 -2.082905, %v436_v4  ;;  %v431_v9 = vadd.f32 0.020062882, %v430_v7 }
 0xdd9   : > { %v438_v6 = vmul.f32 %v437_v5, %v427_v3  ;;  %v432_v12 = vmul.f32 %v431_v9, %v427_v3 }
 0xddb   : > { %v439_v8 = vadd.f32 1.3475366, %v438_v6  ;;  %v433_v13 = vadd.f32 -0.058260266, %v432_v12 }
 0xddd   : > { %v440_v10 = vmul.f32 %v439_v8, %v427_v3  ;;  %v434_v14 = vmul.f32 %v433_v13, %v427_v3 }
 0xddf   : > { %v441_v11 = vadd.f32 -0.6698386, %v440_v10  ;;  %v435_v15 = vadd.f32 0.02932407, %v434_v14 }
 0xde1   : > { %813 = vrcp.f32 %v441_v11 }
 0xdee   : > { %v814_v16 = vpop.eup %813 }
 0xdef   : > { %v443_v17 = vmul.f32 %v814_v16, %v435_v15 }
 0xdf1   : > { %v446_v19 = vsub.f32 %v443_v17, %v444_v18  ;;  %v445_v20 = vadd.f32 %v444_v18, %v443_v17 }
 0xdf3   : > { %447 = vrot.lane.b32.xlu0 %v446_v19, %s920_s29 }
 0xe65   : > { %v448_v21 = vpop.permute.xlu0 %447 }
 0xe66   : > { %v449_v22 = vadd.f32 %v448_v21, %v445_v20 }
 0xe68   : > { %v450_v23 = vmul.f32 0.5, %v449_v22 }
 0xe6a   : > { %451 = vrot.lane.b32.xlu1 %v450_v23, %s921_s30 }
 0xedc   : > { %v452_v24 = vpop.permute.xlu1 %451 }
 0xedd   : > { %v453_v25 = vsub.f32 %v450_v23, %v452_v24 }
 0xedf   : > { %v454_v26 = vmul.f32 0.04, %v453_v25 }
 0xee1   : > { %v455_v27 = vsub.f32 %v427_v3, %v454_v26 }
 0xee3   : > { %456 = vrot.lane.b32.xlu1 %v455_v27, %s920_s29  ;;  %458 = vrot.lane.b32.xlu0 %v455_v27, %s921_s30 }
 0xf55   : > { %v457_v28 = vpop.permute.xlu1 %456  ;;  %v459_v29 = vpop.permute.xlu0 %458 }
 0xf56   : > { %v460_v30 = vsel %vm112_vm1, %v459_v29, %v455_v27 }
 0xf57   : > { %v461_v31 = vsel %vm111_vm0, %v457_v28, %v460_v30 }
 0xf58   : > { %727 = vst [vmem:[%s1009_s26 + $0x4] sm:$0x3] %v461_v31  ;;  %v470_v32 = vmul.f32 -0.00017249228, %v461_v31  ;;  %v464_v35 = vmul.f32 1.6618685e-06, %v461_v31 }
 0xf59   : > { %v478_v46 = vmul.f32 0.5, %v461_v31 }
 0xf5a   : > { %v471_v33 = vadd.f32 -2.082905, %v470_v32  ;;  %v465_v37 = vadd.f32 0.020062882, %v464_v35 }
 0xf5c   : > { %v472_v34 = vmul.f32 %v471_v33, %v461_v31  ;;  %v466_v40 = vmul.f32 %v465_v37, %v461_v31 }
 0xf5e   : > { %v473_v36 = vadd.f32 1.3475366, %v472_v34  ;;  %v467_v41 = vadd.f32 -0.058260266, %v466_v40 }
 0xf60   : > { %v474_v38 = vmul.f32 %v473_v36, %v461_v31  ;;  %v468_v42 = vmul.f32 %v467_v41, %v461_v31 }
 0xf62   : > { %v475_v39 = vadd.f32 -0.6698386, %v474_v38  ;;  %v469_v43 = vadd.f32 0.02932407, %v468_v42 }
 0xf64   : > { %815 = vrcp.f32 %v475_v39 }
 0xf71   : > { %v816_v44 = vpop.eup %815 }
 0xf72   : > { %v477_v45 = vmul.f32 %v816_v44, %v469_v43 }
 0xf74   : > { %v480_v47 = vsub.f32 %v477_v45, %v478_v46  ;;  %v479_v48 = vadd.f32 %v478_v46, %v477_v45 }
 0xf76   : > { %481 = vrot.lane.b32.xlu0 %v480_v47, %s920_s29 }
 0xfe8   : > { %v482_v49 = vpop.permute.xlu0 %481 }
 0xfe9   : > { %v483_v50 = vadd.f32 %v482_v49, %v479_v48 }
 0xfeb   : > { %v484_v51 = vmul.f32 0.5, %v483_v50 }
 0xfed   : > { %485 = vrot.lane.b32.xlu1 %v484_v51, %s921_s30 }
0x105f   : > { %v486_v52 = vpop.permute.xlu1 %485 }
0x1060   : > { %v487_v53 = vsub.f32 %v484_v51, %v486_v52 }
0x1062   : > { %v488_v54 = vmul.f32 0.04, %v487_v53 }
0x1064   : > { %v489_v55 = vsub.f32 %v461_v31, %v488_v54 }
0x1066   : > { %490 = vrot.lane.b32.xlu1 %v489_v55, %s920_s29  ;;  %492 = vrot.lane.b32.xlu0 %v489_v55, %s921_s30 }
0x10d8   : > { %v491_v56 = vpop.permute.xlu1 %490  ;;  %v493_v57 = vpop.permute.xlu0 %492 }
0x10d9   : > { %v494_v58 = vsel %vm112_vm1, %v493_v57, %v489_v55 }
0x10da   : > { %v495_v59 = vsel %vm111_vm0, %v491_v56, %v494_v58 }
0x10db   : > { %728 = vst [vmem:[%s1009_s26 + $0x6] sm:$0x3] %v495_v59  ;;  %v504_v60 = vmul.f32 -0.00017249228, %v495_v59  ;;  %v498_v63 = vmul.f32 1.6618685e-06, %v495_v59 }
0x10dc   : > { %v512_v11 = vmul.f32 0.5, %v495_v59 }
0x10dd   : > { %v505_v61 = vadd.f32 -2.082905, %v504_v60  ;;  %v499_v2 = vadd.f32 0.020062882, %v498_v63 }
0x10df   : > { %v506_v62 = vmul.f32 %v505_v61, %v495_v59  ;;  %v500_v5 = vmul.f32 %v499_v2, %v495_v59 }
0x10e1   : > { %v507_v0 = vadd.f32 1.3475366, %v506_v62  ;;  %v501_v6 = vadd.f32 -0.058260266, %v500_v5 }
0x10e3   : > { %v508_v3 = vmul.f32 %v507_v0, %v495_v59  ;;  %v502_v7 = vmul.f32 %v501_v6, %v495_v59 }
0x10e5   : > { %v509_v4 = vadd.f32 -0.6698386, %v508_v3  ;;  %v503_v8 = vadd.f32 0.02932407, %v502_v7 }
0x10e7   : > { %817 = vrcp.f32 %v509_v4 }
0x10f4   : > { %v818_v9 = vpop.eup %817 }
0x10f5   : > { %v511_v10 = vmul.f32 %v818_v9, %v503_v8 }
0x10f7   : > { %v514_v12 = vsub.f32 %v511_v10, %v512_v11  ;;  %v513_v13 = vadd.f32 %v512_v11, %v511_v10 }
0x10f9   : > { %515 = vrot.lane.b32.xlu0 %v514_v12, %s920_s29 }
0x116b   : > { %v516_v14 = vpop.permute.xlu0 %515 }
0x116c   : > { %v517_v15 = vadd.f32 %v516_v14, %v513_v13 }
0x116e   : > { %v518_v16 = vmul.f32 0.5, %v517_v15 }
0x1170   : > { %519 = vrot.lane.b32.xlu1 %v518_v16, %s921_s30 }
0x11e2   : > { %v520_v17 = vpop.permute.xlu1 %519 }
0x11e3   : > { %v521_v18 = vsub.f32 %v518_v16, %v520_v17 }
0x11e5   : > { %v522_v19 = vmul.f32 0.04, %v521_v18 }
0x11e7   : > { %v523_v20 = vsub.f32 %v495_v59, %v522_v19 }
0x11e9   : > { %524 = vrot.lane.b32.xlu1 %v523_v20, %s920_s29  ;;  %526 = vrot.lane.b32.xlu0 %v523_v20, %s921_s30 }
0x125b   : > { %v525_v21 = vpop.permute.xlu1 %524  ;;  %v527_v22 = vpop.permute.xlu0 %526 }
0x125c   : > { %v528_v23 = vsel %vm112_vm1, %v527_v22, %v523_v20 }
0x125d   : > { %v529_v24 = vsel %vm111_vm0, %v525_v21, %v528_v23 }
0x125e   : > { %729 = vst [vmem:[%s1009_s26 + $0x8] sm:$0x3] %v529_v24  ;;  %v538_v25 = vmul.f32 -0.00017249228, %v529_v24  ;;  %v532_v28 = vmul.f32 1.6618685e-06, %v529_v24 }
0x125f   : > { %v546_v39 = vmul.f32 0.5, %v529_v24 }
0x1260   : > { %v539_v26 = vadd.f32 -2.082905, %v538_v25  ;;  %v533_v30 = vadd.f32 0.020062882, %v532_v28 }
0x1262   : > { %v540_v27 = vmul.f32 %v539_v26, %v529_v24  ;;  %v534_v33 = vmul.f32 %v533_v30, %v529_v24 }
0x1264   : > { %v541_v29 = vadd.f32 1.3475366, %v540_v27  ;;  %v535_v34 = vadd.f32 -0.058260266, %v534_v33 }
0x1266   : > { %v542_v31 = vmul.f32 %v541_v29, %v529_v24  ;;  %v536_v35 = vmul.f32 %v535_v34, %v529_v24 }
0x1268   : > { %v543_v32 = vadd.f32 -0.6698386, %v542_v31  ;;  %v537_v36 = vadd.f32 0.02932407, %v536_v35 }
0x126a   : > { %819 = vrcp.f32 %v543_v32 }
0x1277   : > { %v820_v37 = vpop.eup %819 }
0x1278   : > { %v545_v38 = vmul.f32 %v820_v37, %v537_v36 }
0x127a   : > { %v548_v40 = vsub.f32 %v545_v38, %v546_v39  ;;  %v547_v41 = vadd.f32 %v546_v39, %v545_v38 }
0x127c   : > { %549 = vrot.lane.b32.xlu0 %v548_v40, %s920_s29 }
0x12ee   : > { %v550_v42 = vpop.permute.xlu0 %549 }
0x12ef   : > { %v551_v43 = vadd.f32 %v550_v42, %v547_v41 }
0x12f1   : > { %v552_v44 = vmul.f32 0.5, %v551_v43 }
0x12f3   : > { %553 = vrot.lane.b32.xlu1 %v552_v44, %s921_s30 }
0x1365   : > { %v554_v45 = vpop.permute.xlu1 %553 }
0x1366   : > { %v555_v46 = vsub.f32 %v552_v44, %v554_v45 }
0x1368   : > { %v556_v47 = vmul.f32 0.04, %v555_v46 }
0x136a   : > { %v557_v48 = vsub.f32 %v529_v24, %v556_v47 }
0x136c   : > { %558 = vrot.lane.b32.xlu1 %v557_v48, %s920_s29  ;;  %560 = vrot.lane.b32.xlu0 %v557_v48, %s921_s30 }
0x13de   : > { %v559_v49 = vpop.permute.xlu1 %558  ;;  %v561_v50 = vpop.permute.xlu0 %560 }
0x13df   : > { %v562_v51 = vsel %vm112_vm1, %v561_v50, %v557_v48 }
0x13e0   : > { %v563_v52 = vsel %vm111_vm0, %v559_v49, %v562_v51 }
0x13e1   : > { %730 = vst [vmem:[%s1009_s26 + $0xa] sm:$0x3] %v563_v52  ;;  %v572_v53 = vmul.f32 -0.00017249228, %v563_v52  ;;  %v566_v56 = vmul.f32 1.6618685e-06, %v563_v52 }
0x13e2   : > { %v580_v4 = vmul.f32 0.5, %v563_v52 }
0x13e3   : > { %v573_v54 = vadd.f32 -2.082905, %v572_v53  ;;  %v567_v58 = vadd.f32 0.020062882, %v566_v56 }
0x13e5   : > { %v574_v55 = vmul.f32 %v573_v54, %v563_v52  ;;  %v568_v61 = vmul.f32 %v567_v58, %v563_v52 }
0x13e7   : > { %v575_v57 = vadd.f32 1.3475366, %v574_v55  ;;  %v569_v62 = vadd.f32 -0.058260266, %v568_v61 }
0x13e9   : > { %v576_v59 = vmul.f32 %v575_v57, %v563_v52  ;;  %v570_v63 = vmul.f32 %v569_v62, %v563_v52 }
0x13eb   : > { %v577_v60 = vadd.f32 -0.6698386, %v576_v59  ;;  %v571_v0 = vadd.f32 0.02932407, %v570_v63 }
0x13ed   : > { %821 = vrcp.f32 %v577_v60 }
0x13fa   : > { %v822_v2 = vpop.eup %821 }
0x13fb   : > { %v579_v3 = vmul.f32 %v822_v2, %v571_v0 }
0x13fd   : > { %v582_v5 = vsub.f32 %v579_v3, %v580_v4  ;;  %v581_v6 = vadd.f32 %v580_v4, %v579_v3 }
0x13ff   : > { %583 = vrot.lane.b32.xlu0 %v582_v5, %s920_s29 }
0x1471   : > { %v584_v7 = vpop.permute.xlu0 %583 }
0x1472   : > { %v585_v8 = vadd.f32 %v584_v7, %v581_v6 }
0x1474   : > { %v586_v9 = vmul.f32 0.5, %v585_v8 }
0x1476   : > { %587 = vrot.lane.b32.xlu1 %v586_v9, %s921_s30 }
0x14e8   : > { %v588_v10 = vpop.permute.xlu1 %587 }
0x14e9   : > { %v589_v11 = vsub.f32 %v586_v9, %v588_v10 }
0x14eb   : > { %v590_v12 = vmul.f32 0.04, %v589_v11 }
0x14ed   : > { %v591_v13 = vsub.f32 %v563_v52, %v590_v12 }
0x14ef   : > { %592 = vrot.lane.b32.xlu1 %v591_v13, %s920_s29  ;;  %594 = vrot.lane.b32.xlu0 %v591_v13, %s921_s30 }
0x1561   : > { %v593_v14 = vpop.permute.xlu1 %592  ;;  %v595_v15 = vpop.permute.xlu0 %594 }
0x1562   : > { %v596_v16 = vsel %vm112_vm1, %v595_v15, %v591_v13 }
0x1563   : > { %v597_v17 = vsel %vm111_vm0, %v593_v14, %v596_v16 }
0x1564   : > { %731 = vst [vmem:[%s1009_s26 + $0xc] sm:$0x3] %v597_v17  ;;  %v606_v18 = vmul.f32 -0.00017249228, %v597_v17  ;;  %v600_v21 = vmul.f32 1.6618685e-06, %v597_v17 }
0x1565   : > { %v614_v32 = vmul.f32 0.5, %v597_v17 }
0x1566   : > { %v607_v19 = vadd.f32 -2.082905, %v606_v18  ;;  %v601_v23 = vadd.f32 0.020062882, %v600_v21 }
0x1568   : > { %v608_v20 = vmul.f32 %v607_v19, %v597_v17  ;;  %v602_v26 = vmul.f32 %v601_v23, %v597_v17 }
0x156a   : > { %v609_v22 = vadd.f32 1.3475366, %v608_v20  ;;  %v603_v27 = vadd.f32 -0.058260266, %v602_v26 }
0x156c   : > { %v610_v24 = vmul.f32 %v609_v22, %v597_v17  ;;  %v604_v28 = vmul.f32 %v603_v27, %v597_v17 }
0x156e   : > { %v611_v25 = vadd.f32 -0.6698386, %v610_v24  ;;  %v605_v29 = vadd.f32 0.02932407, %v604_v28 }
0x1570   : > { %823 = vrcp.f32 %v611_v25 }
0x157d   : > { %v824_v30 = vpop.eup %823 }
0x157e   : > { %v613_v31 = vmul.f32 %v824_v30, %v605_v29 }
0x1580   : > { %v616_v33 = vsub.f32 %v613_v31, %v614_v32  ;;  %v615_v34 = vadd.f32 %v614_v32, %v613_v31 }
0x1582   : > { %617 = vrot.lane.b32.xlu0 %v616_v33, %s920_s29 }
0x15f4   : > { %v618_v35 = vpop.permute.xlu0 %617 }
0x15f5   : > { %v619_v36 = vadd.f32 %v618_v35, %v615_v34 }
0x15f7   : > { %v620_v37 = vmul.f32 0.5, %v619_v36 }
0x15f9   : > { %621 = vrot.lane.b32.xlu1 %v620_v37, %s921_s30 }
0x166b   : > { %v622_v38 = vpop.permute.xlu1 %621 }
0x166c   : > { %v623_v39 = vsub.f32 %v620_v37, %v622_v38 }
0x166e   : > { %v624_v40 = vmul.f32 0.04, %v623_v39 }
0x1670   : > { %v625_v41 = vsub.f32 %v597_v17, %v624_v40 }
0x1672   : > { %626 = vrot.lane.b32.xlu1 %v625_v41, %s920_s29  ;;  %628 = vrot.lane.b32.xlu0 %v625_v41, %s921_s30 }
0x16e4   : > { %v627_v42 = vpop.permute.xlu1 %626  ;;  %v629_v43 = vpop.permute.xlu0 %628 }
0x16e5   : > { %v630_v44 = vsel %vm112_vm1, %v629_v43, %v625_v41 }
0x16e6   : > { %v631_v45 = vsel %vm111_vm0, %v627_v42, %v630_v44 }
0x16e7   : > { %732 = vst [vmem:[%s1009_s26 + $0xe] sm:$0x3] %v631_v45  ;;  %634 = vst [vmem:[#allocation2] sm:$0x3] %v631_v45 }
0x16e8 PF: > { %s738_s2 = sshll.u32 %s956_s10, 8  ;;  %s649_s11 = sshll.u32 %s1009_s26, 4  ;;  %s1157_s11 = int_to_ptr.vmem [resolvable:$true] %s649_s11 }
0x16e9   : > { %s1154_s5 = scalar_lea.hbm %s1202_s1, %s738_s2  ;;  %s1161_s13 = scalar_lea.sflag [#allocation5], %s105_s24 }
0x16ea   : > { %s851_s14 = scalar_lea.vmem %s1157_s11, 256  ;;  %s922_s10 = smov [#allocation6]  }
0x16eb   : > { %p852_p9 = scmp.ne.s32.totalorder %s1157_s11, %s851_s14  ;;  %s855_s18 = sshll.u32 %s922_s10, 4  ;;  %s856_s18 = int_to_ptr.vmem [resolvable:$false] %s855_s18 }
0x16ec   : > { %s857_s19 = scalar_lea.vmem %s856_s18, 512  ;;  %p858_p12 = scmp.lt.s32.totalorder %s1157_s11, %s856_s18 }
0x16ed   : > { %p853_p10 = pnand %p852_p9, %p973_p5  ;;  %p859_p13 = scmp.lt.s32.totalorder %s857_s19, %s851_s14 }
0x16ef   : > { %p854_p11 = pneg %p853_p10  ;;  %p860_p0 = por %p859_p13, %p858_p12 }
0x16f1   : > { %p861_p1 = pnand %p860_p0, %p854_p11 }
0x16f3   : > { %864 = shalt.err (!%p861_p1)
}
0x16f4   : > { %s865_s20 = scalar_lea.hbm %s1154_s5, 256  ;;  %s869_s23 = scalar_lea.hbm %s1202_s1, 2048 }
0x16f5   : > { %p866_p2 = scmp.ne.s32.totalorder %s1154_s5, %s865_s20  ;;  %p870_p7 = scmp.lt.s32.totalorder %s1154_s5, %s1202_s1 }
0x16f6   : > { %p871_p6 = scmp.lt.s32.totalorder %s869_s23, %s865_s20 }
0x16f7   : > { %p867_p3 = pnand %p866_p2, %p973_p5 }
0x16f8   : > { %p872_p8 = por %p871_p6, %p870_p7 }
0x16f9   : > { %p868_p4 = pneg %p867_p3 }
0x16fb   : > { %p873_p9 = pnand %p872_p8, %p868_p4 }
0x16fd   : > { %876 = shalt.err (!%p873_p9)
}
0x16fe   : > { %s923_s26 = smov 32   ;;  %s924_s27 = smov 2  }
0x16ff   : > { %743 = dma.vmem_to_hbm [thread:$0]  (%p973_p5), %s1157_s11, 256, %s1154_s5, %s1161_s13, %s923_s26, %s923_s26, %s924_s27  }
0x1700 PF: > { %p755_p10 = scmp.ge.s32.totalorder %s915_s9, 2  ;;  %s664_s28 = sand.u32 1, %s903_s6  }
0x1701   : > { %p1207_p11 = scmp.ne.s32.totalorder %s1204_s17, 0  ;;  %s665_s29 = scalar_lea.sflag [#allocation5], %s664_s28 }
0x1703   : > { %p750_p12 = pnand %p755_p10, %p1207_p11 }
0x1705   : > { %p751_p13 = pneg %p750_p12 }
0x1707   : > { %898 = dma.done.wait (%p751_p13), %s665_s29, 256  }
0x1708   : > { %900 = vsyncadd (%p751_p13), %s665_s29, 4294967040  ;;  %p12_p0 = scmp.ge.s32.totalorder %s960_s12, 10   ;;  %s1208_s6 = smov %s907_s7 }
0x1709   : > { %s1209_s7 = smov %s911_s8  ;;  %s1210_s8 = smov %s971_s15 }
0x170a   : > { %s1211_s9 = smov %s960_s12  ;;  %14 = sbr.rel (!%p12_p0) target bundleno = 4 (0x4), region = 83 }
0x170f   :  { %670 = vsyncpa [#allocation4], 1 }
0x1710   :  { %672 = vsyncpa [#allocation4 + $0x1], 1 }
0x1711   :  { %673 = vsyncpa [#allocation5], 1 }
0x1712   :  { %675 = vsyncpa [#allocation5 + $0x1], 1 }

</bundles_post_ra>
